<compile_context>
chip_gen: v5e
topology: v5e:2x2
jax: 0.10.0
libtpu: 0.0.40
codegen_flags: <defaults>
</compile_context>

<pallas_src>
import jax
import jax.numpy as jnp
from jax import lax
from jax.experimental import pallas as pl
from jax.experimental.pallas import tpu as pltpu

# ---- static model geometry (forced by fc1.in_features == 50) -----------------
L_IN, C_IN = 89, 15          # input length / channels
C1, K1 = 10, 3               # conv1: Conv1d(15, 10, 3)
L1 = L_IN - K1 + 1           # 87
P1 = L1 // 3                 # 29  (max_pool1d kernel=stride=3; 87 = 3*29 exactly)
C2, K2 = 10, 5               # conv2: Conv1d(10, 10, 5)
L2 = P1 - K2 + 1             # 25
P2 = L2 // 5                 # 5   (max_pool1d kernel=stride=5; 25 = 5*5 exactly)
F_IN = C2 * P2               # 50
H1, H2, H3 = 100, 30, 20     # fc1 / fc2 / fc3 out features
CK1 = C_IN * K1              # 45  im2col feature width for conv1
CK2 = C1 * K2                # 50  im2col feature width for conv2

HI = lax.Precision.HIGHEST   # reference only


# ------------------------------ Pallas kernel ---------------------------------
def net_kernel(x_ref, w1_ref, b1_ref, w2_ref, b2_ref,
               wf1_ref, bf1_ref, wf2_ref, bf2_ref, wf3_ref, bf3_ref, o_ref):
    x = x_ref[0]                              # (L1*bt, 45), rows = (pos, sample)
    bt = x.shape[0] // L1                     # batch-tile size (static, multiple of 8)
    f32 = jnp.float32

    # ---- conv1 (im2col'ed in the wrapper): one MXU matmul, batch*length in M
    h1 = jnp.dot(x, w1_ref[...], preferred_element_type=f32)
    h1 = jnp.maximum(h1 + b1_ref[...], 0.0)   # (L1*bt, C1)

    # ---- max_pool1d(kernel=3, stride=3): tile-aligned sublane regroup + VPU max
    h1 = h1.reshape(P1, 3 * bt, C1)
    p1 = jnp.maximum(jnp.maximum(h1[:, 0:bt], h1[:, bt:2 * bt]),
                     h1[:, 2 * bt:3 * bt])    # (P1, bt, C1)

    # ---- conv2: lane-concat K2 shifted slices into (L2, bt, 50) patches, one matmul
    pat2 = jnp.concatenate([p1[k:k + L2] for k in range(K2)], axis=-1)
    pat2 = pat2.reshape(L2 * bt, CK2)
    h2 = jnp.dot(pat2, w2_ref[...], preferred_element_type=f32)
    h2 = jnp.maximum(h2 + b2_ref[...], 0.0)   # (L2*bt, C2)

    # ---- max_pool1d(kernel=5, stride=5)
    h2 = h2.reshape(P2, 5 * bt, C2)
    p2 = h2[:, 0:bt]
    for r in range(1, 5):
        p2 = jnp.maximum(p2, h2[:, r * bt:(r + 1) * bt])   # (P2, bt, C2)

    # ---- flatten (pos-major, channel-minor) -> matches fc1 weight permuted in wrapper
    flat = jnp.concatenate([p2[l] for l in range(P2)], axis=-1)   # (bt, 50)

    # ---- fc stack: single dense matmuls with batch in M
    z1 = jnp.maximum(jnp.dot(flat, wf1_ref[...], preferred_element_type=f32)
                     + bf1_ref[...], 0.0)
    z2 = jnp.maximum(jnp.dot(z1, wf2_ref[...], preferred_element_type=f32)
                     + bf2_ref[...], 0.0)
    z3 = jnp.dot(z2, wf3_ref[...], preferred_element_type=f32) + bf3_ref[...]

    o_ref[0] = z3                             # dense (bt, 20) slab store


# ------------------------------ wrapper ----------------------------------------
def _round_up(v, m):
    return (v + m - 1) // m * m


def _const_spec(a):
    nd = a.ndim
    return pl.BlockSpec(a.shape, lambda g, _nd=nd: (0,) * _nd)


def net_forward(x_ncl, raw_params, *, b_tile=64):
    """x_ncl: (B, 15, 89) float32 (PyTorch NCL layout). Returns (B, 20) float32."""
    (c1w, c1b, c2w, c2b, f1w, f1b, f2w, f2b, f3w, f3b) = raw_params
    B = x_ncl.shape[0]

    # batch tile: multiple of 8 (tile-aligned sublane regrouping in the kernel)
    bt = min(_round_up(b_tile, 8), _round_up(B, 8))
    b_pad = _round_up(B, bt)
    G = b_pad // bt

    x = x_ncl.astype(jnp.float32)
    x = jnp.pad(x, ((0, b_pad - B), (0, 0), (0, 0)))

    # im2col for conv1 (feature order k*C_IN + c_in), laid out as (G, L1*bt, 45)
    # so each grid step's LHS is already a dense 2D (batch*length, 45) matrix.
    pat = jnp.concatenate([x[:, :, k:k + L1] for k in range(K1)], axis=1)  # (b_pad, 45, L1)
    pat = jnp.transpose(pat, (2, 0, 1))                                    # (L1, b_pad, 45)
    pat = pat.reshape(L1, G, bt, CK1).transpose(1, 0, 2, 3).reshape(G, L1 * bt, CK1)

    # weights repacked for the kernel's (rows = batch*length, lanes = features) layout
    w1 = jnp.transpose(c1w, (2, 1, 0)).reshape(CK1, C1)        # [k*C_IN+i, o]
    w2 = jnp.transpose(c2w, (2, 1, 0)).reshape(CK2, C2)        # [k*C1 +i, o]
    wf1 = jnp.transpose(f1w.reshape(H1, C2, P2), (2, 1, 0)).reshape(P2 * C2, H1)
    wf2 = f2w.T
    wf3 = f3w.T
    b1 = c1b.reshape(1, C1)
    b2 = c2b.reshape(1, C2)
    bf1 = f1b.reshape(1, H1)
    bf2 = f2b.reshape(1, H2)
    bf3 = f3b.reshape(1, H3)

    consts = [w1, b1, w2, b2, wf1, bf1, wf2, bf2, wf3, bf3]

    out = pl.pallas_call(
        net_kernel,
        out_shape=jax.ShapeDtypeStruct((G, bt, H3), jnp.float32),
        grid=(G,),
        in_specs=[pl.BlockSpec((1, L1 * bt, CK1), lambda g: (g, 0, 0))]
                 + [_const_spec(a) for a in consts],
        out_specs=pl.BlockSpec((1, bt, H3), lambda g: (g, 0, 0)),
        compiler_params=pltpu.CompilerParams(
            dimension_semantics=("parallel",)),
        # TODO(synk): for b_tile >= 128 raise vmem_limit_bytes (mind v7x's 64 MiB VMEM).
    )(pat, *consts)

    return out.reshape(G * bt, H3)[:B]


# ------------------------------ reference & init -------------------------------
def reference(x_ncl, raw_params):
    c1w, c1b, c2w, c2b, f1w, f1b, f2w, f2b, f3w, f3b = raw_params
    dn = ("NCH", "OIH", "NCH")
    x = lax.conv_general_dilated(x_ncl, c1w, (1,), "VALID",
                                 dimension_numbers=dn, precision=HI)
    x = jax.nn.relu(x + c1b[None, :, None])
    x = lax.reduce_window(x, -jnp.inf, lax.max, (1, 1, 3), (1, 1, 3), "VALID")
    x = lax.conv_general_dilated(x, c2w, (1,), "VALID",
                                 dimension_numbers=dn, precision=HI)
    x = jax.nn.relu(x + c2b[None, :, None])
    x = lax.reduce_window(x, -jnp.inf, lax.max, (1, 1, 5), (1, 1, 5), "VALID")
    x = x.reshape(x.shape[0], -1)
    x = jax.nn.relu(jnp.dot(x, f1w.T, precision=HI) + f1b)
    x = jax.nn.relu(jnp.dot(x, f2w.T, precision=HI) + f2b)
    return jnp.dot(x, f3w.T, precision=HI) + f3b


def init_params(key):
    def uni(k, shape, fan_in):
        bound = 1.0 / jnp.sqrt(fan_in)
        return jax.random.uniform(k, shape, jnp.float32, -bound, bound)
    ks = jax.random.split(key, 10)
    return (
        uni(ks[0], (C1, C_IN, K1), C_IN * K1), uni(ks[1], (C1,), C_IN * K1),   # conv1
        uni(ks[2], (C2, C1, K2), C1 * K2),     uni(ks[3], (C2,), C1 * K2),     # conv2
        uni(ks[4], (H1, F_IN), F_IN),          uni(ks[5], (H1,), F_IN),        # fc1
        uni(ks[6], (H2, H1), H1),              uni(ks[7], (H2,), H1),          # fc2
        uni(ks[8], (H3, H2), H2),              uni(ks[9], (H3,), H2),          # fc3
    )


if __name__ == "__main__":
    key = jax.random.PRNGKey(0)
    kx, kp = jax.random.split(key)
    B = 2
    x = jax.random.normal(kx, (B, C_IN, L_IN), jnp.float32)   # PyTorch NCL input
    params = init_params(kp)

    out = jax.block_until_ready(net_forward(x, params))
    ref = jax.block_until_ready(reference(x, params))

    assert out.shape == (B, H3), out.shape
    assert jnp.all(jnp.isfinite(out))
    # kernel matmuls use default (bf16 MXU) precision; reference is f32 HIGHEST
    err = float(jnp.max(jnp.abs(out - ref)))
    assert jnp.allclose(out, ref, rtol=3e-2, atol=3e-2), err
    print("KERNEL_OK")
</pallas_src>

<mosaic_0001>
module attributes {stable_mosaic.version = 11 : i64} {
  func.func @net_kernel(%arg0: i32, %arg1: memref<1x696x45xf32, #tpu.memory_space<vmem>>, %arg2: memref<45x10xf32, #tpu.memory_space<vmem>>, %arg3: memref<1x10xf32, #tpu.memory_space<vmem>>, %arg4: memref<50x10xf32, #tpu.memory_space<vmem>>, %arg5: memref<1x10xf32, #tpu.memory_space<vmem>>, %arg6: memref<50x100xf32, #tpu.memory_space<vmem>>, %arg7: memref<1x100xf32, #tpu.memory_space<vmem>>, %arg8: memref<100x30xf32, #tpu.memory_space<vmem>>, %arg9: memref<1x30xf32, #tpu.memory_space<vmem>>, %arg10: memref<30x20xf32, #tpu.memory_space<vmem>>, %arg11: memref<1x20xf32, #tpu.memory_space<vmem>>, %arg12: memref<1x8x20xf32, #tpu.memory_space<vmem>>) attributes {dimension_semantics = [#tpu.dimension_semantics<parallel>], iteration_bounds = array<i64: 1>, scalar_prefetch = 0 : i64, scratch_operands = 0 : i64, tpu.core_type = #tpu.core_type<tc>, window_params = [{transform_indices = @transform_0, window_bounds = array<i64: 1, 696, 45>}, {pipeline_mode = #tpu.pipeline_mode<synchronous>, transform_indices = @transform_1, window_bounds = array<i64: 45, 10>}, {pipeline_mode = #tpu.pipeline_mode<synchronous>, transform_indices = @transform_2, window_bounds = array<i64: 1, 10>}, {pipeline_mode = #tpu.pipeline_mode<synchronous>, transform_indices = @transform_3, window_bounds = array<i64: 50, 10>}, {pipeline_mode = #tpu.pipeline_mode<synchronous>, transform_indices = @transform_4, window_bounds = array<i64: 1, 10>}, {pipeline_mode = #tpu.pipeline_mode<synchronous>, transform_indices = @transform_5, window_bounds = array<i64: 50, 100>}, {pipeline_mode = #tpu.pipeline_mode<synchronous>, transform_indices = @transform_6, window_bounds = array<i64: 1, 100>}, {pipeline_mode = #tpu.pipeline_mode<synchronous>, transform_indices = @transform_7, window_bounds = array<i64: 100, 30>}, {pipeline_mode = #tpu.pipeline_mode<synchronous>, transform_indices = @transform_8, window_bounds = array<i64: 1, 30>}, {pipeline_mode = #tpu.pipeline_mode<synchronous>, transform_indices = @transform_9, window_bounds = array<i64: 30, 20>}, {pipeline_mode = #tpu.pipeline_mode<synchronous>, transform_indices = @transform_10, window_bounds = array<i64: 1, 20>}, {transform_indices = @transform_11, window_bounds = array<i64: 1, 8, 20>}]} {
    %c0 = arith.constant 0 : index
    %c0_0 = arith.constant 0 : index
    %c0_1 = arith.constant 0 : index
    %0 = vector.load %arg1[%c0, %c0_0, %c0_1] : memref<1x696x45xf32, #tpu.memory_space<vmem>>, vector<1x696x45xf32>
    %1 = vector.shape_cast %0 : vector<1x696x45xf32> to vector<696x45xf32>
    %c0_2 = arith.constant 0 : index
    %c0_3 = arith.constant 0 : index
    %2 = vector.load %arg2[%c0_2, %c0_3] : memref<45x10xf32, #tpu.memory_space<vmem>>, vector<45x10xf32>
    %cst = arith.constant dense<0.000000e+00> : vector<696x10xf32>
    %3 = tpu.matmul %1, %2, %cst {dimension_numbers = #tpu.dot_dimension_numbers<[1], [0], [0], [1], [0, 0, 1, 1], [], []>} : vector<696x45xf32>, vector<45x10xf32>, vector<696x10xf32> -> vector<696x10xf32>
    %c0_4 = arith.constant 0 : index
    %c0_5 = arith.constant 0 : index
    %4 = vector.load %arg3[%c0_4, %c0_5] : memref<1x10xf32, #tpu.memory_space<vmem>>, vector<1x10xf32>
    %5 = vector.broadcast %4 : vector<1x10xf32> to vector<696x10xf32>
    %6 = arith.addf %3, %5 : vector<696x10xf32>
    %cst_6 = arith.constant 0.000000e+00 : f32
    %7 = vector.broadcast %cst_6 : f32 to vector<696x10xf32>
    %8 = arith.maximumf %6, %7 : vector<696x10xf32>
    %9 = vector.shape_cast %8 : vector<696x10xf32> to vector<29x24x10xf32>
    %10 = vector.extract_strided_slice %9 {offsets = [0, 0, 0], sizes = [29, 8, 10], strides = [1, 1, 1]} : vector<29x24x10xf32> to vector<29x8x10xf32>
    %11 = vector.extract_strided_slice %9 {offsets = [0, 8, 0], sizes = [29, 8, 10], strides = [1, 1, 1]} : vector<29x24x10xf32> to vector<29x8x10xf32>
    %12 = arith.maximumf %10, %11 : vector<29x8x10xf32>
    %13 = vector.extract_strided_slice %9 {offsets = [0, 16, 0], sizes = [29, 8, 10], strides = [1, 1, 1]} : vector<29x24x10xf32> to vector<29x8x10xf32>
    %14 = arith.maximumf %12, %13 : vector<29x8x10xf32>
    %15 = vector.extract_strided_slice %14 {offsets = [0, 0, 0], sizes = [25, 8, 10], strides = [1, 1, 1]} : vector<29x8x10xf32> to vector<25x8x10xf32>
    %16 = vector.extract_strided_slice %14 {offsets = [1, 0, 0], sizes = [25, 8, 10], strides = [1, 1, 1]} : vector<29x8x10xf32> to vector<25x8x10xf32>
    %17 = vector.extract_strided_slice %14 {offsets = [2, 0, 0], sizes = [25, 8, 10], strides = [1, 1, 1]} : vector<29x8x10xf32> to vector<25x8x10xf32>
    %18 = vector.extract_strided_slice %14 {offsets = [3, 0, 0], sizes = [25, 8, 10], strides = [1, 1, 1]} : vector<29x8x10xf32> to vector<25x8x10xf32>
    %19 = vector.extract_strided_slice %14 {offsets = [4, 0, 0], sizes = [25, 8, 10], strides = [1, 1, 1]} : vector<29x8x10xf32> to vector<25x8x10xf32>
    %20 = tpu.concatenate %15, %16, %17, %18, %19 in 2 : vector<25x8x10xf32>, vector<25x8x10xf32>, vector<25x8x10xf32>, vector<25x8x10xf32>, vector<25x8x10xf32> -> vector<25x8x50xf32>
    %21 = vector.shape_cast %20 : vector<25x8x50xf32> to vector<200x50xf32>
    %c0_7 = arith.constant 0 : index
    %c0_8 = arith.constant 0 : index
    %22 = vector.load %arg4[%c0_7, %c0_8] : memref<50x10xf32, #tpu.memory_space<vmem>>, vector<50x10xf32>
    %cst_9 = arith.constant dense<0.000000e+00> : vector<200x10xf32>
    %23 = tpu.matmul %21, %22, %cst_9 {dimension_numbers = #tpu.dot_dimension_numbers<[1], [0], [0], [1], [0, 0, 1, 1], [], []>} : vector<200x50xf32>, vector<50x10xf32>, vector<200x10xf32> -> vector<200x10xf32>
    %c0_10 = arith.constant 0 : index
    %c0_11 = arith.constant 0 : index
    %24 = vector.load %arg5[%c0_10, %c0_11] : memref<1x10xf32, #tpu.memory_space<vmem>>, vector<1x10xf32>
    %25 = vector.broadcast %24 : vector<1x10xf32> to vector<200x10xf32>
    %26 = arith.addf %23, %25 : vector<200x10xf32>
    %cst_12 = arith.constant 0.000000e+00 : f32
    %27 = vector.broadcast %cst_12 : f32 to vector<200x10xf32>
    %28 = arith.maximumf %26, %27 : vector<200x10xf32>
    %29 = vector.shape_cast %28 : vector<200x10xf32> to vector<5x40x10xf32>
    %30 = vector.extract_strided_slice %29 {offsets = [0, 0, 0], sizes = [5, 8, 10], strides = [1, 1, 1]} : vector<5x40x10xf32> to vector<5x8x10xf32>
    %31 = vector.extract_strided_slice %29 {offsets = [0, 8, 0], sizes = [5, 8, 10], strides = [1, 1, 1]} : vector<5x40x10xf32> to vector<5x8x10xf32>
    %32 = arith.maximumf %30, %31 : vector<5x8x10xf32>
    %33 = vector.extract_strided_slice %29 {offsets = [0, 16, 0], sizes = [5, 8, 10], strides = [1, 1, 1]} : vector<5x40x10xf32> to vector<5x8x10xf32>
    %34 = arith.maximumf %32, %33 : vector<5x8x10xf32>
    %35 = vector.extract_strided_slice %29 {offsets = [0, 24, 0], sizes = [5, 8, 10], strides = [1, 1, 1]} : vector<5x40x10xf32> to vector<5x8x10xf32>
    %36 = arith.maximumf %34, %35 : vector<5x8x10xf32>
    %37 = vector.extract_strided_slice %29 {offsets = [0, 32, 0], sizes = [5, 8, 10], strides = [1, 1, 1]} : vector<5x40x10xf32> to vector<5x8x10xf32>
    %38 = arith.maximumf %36, %37 : vector<5x8x10xf32>
    %39 = vector.extract_strided_slice %38 {offsets = [0, 0, 0], sizes = [1, 8, 10], strides = [1, 1, 1]} : vector<5x8x10xf32> to vector<1x8x10xf32>
    %40 = vector.shape_cast %39 : vector<1x8x10xf32> to vector<8x10xf32>
    %41 = vector.extract_strided_slice %38 {offsets = [1, 0, 0], sizes = [1, 8, 10], strides = [1, 1, 1]} : vector<5x8x10xf32> to vector<1x8x10xf32>
    %42 = vector.shape_cast %41 : vector<1x8x10xf32> to vector<8x10xf32>
    %43 = vector.extract_strided_slice %38 {offsets = [2, 0, 0], sizes = [1, 8, 10], strides = [1, 1, 1]} : vector<5x8x10xf32> to vector<1x8x10xf32>
    %44 = vector.shape_cast %43 : vector<1x8x10xf32> to vector<8x10xf32>
    %45 = vector.extract_strided_slice %38 {offsets = [3, 0, 0], sizes = [1, 8, 10], strides = [1, 1, 1]} : vector<5x8x10xf32> to vector<1x8x10xf32>
    %46 = vector.shape_cast %45 : vector<1x8x10xf32> to vector<8x10xf32>
    %47 = vector.extract_strided_slice %38 {offsets = [4, 0, 0], sizes = [1, 8, 10], strides = [1, 1, 1]} : vector<5x8x10xf32> to vector<1x8x10xf32>
    %48 = vector.shape_cast %47 : vector<1x8x10xf32> to vector<8x10xf32>
    %49 = tpu.concatenate %40, %42, %44, %46, %48 in 1 : vector<8x10xf32>, vector<8x10xf32>, vector<8x10xf32>, vector<8x10xf32>, vector<8x10xf32> -> vector<8x50xf32>
    %c0_13 = arith.constant 0 : index
    %c0_14 = arith.constant 0 : index
    %50 = vector.load %arg6[%c0_13, %c0_14] : memref<50x100xf32, #tpu.memory_space<vmem>>, vector<50x100xf32>
    %cst_15 = arith.constant dense<0.000000e+00> : vector<8x100xf32>
    %51 = tpu.matmul %49, %50, %cst_15 {dimension_numbers = #tpu.dot_dimension_numbers<[1], [0], [0], [1], [0, 0, 1, 1], [], []>} : vector<8x50xf32>, vector<50x100xf32>, vector<8x100xf32> -> vector<8x100xf32>
    %c0_16 = arith.constant 0 : index
    %c0_17 = arith.constant 0 : index
    %52 = vector.load %arg7[%c0_16, %c0_17] : memref<1x100xf32, #tpu.memory_space<vmem>>, vector<1x100xf32>
    %53 = vector.broadcast %52 : vector<1x100xf32> to vector<8x100xf32>
    %54 = arith.addf %51, %53 : vector<8x100xf32>
    %cst_18 = arith.constant 0.000000e+00 : f32
    %55 = vector.broadcast %cst_18 : f32 to vector<8x100xf32>
    %56 = arith.maximumf %54, %55 : vector<8x100xf32>
    %c0_19 = arith.constant 0 : index
    %c0_20 = arith.constant 0 : index
    %57 = vector.load %arg8[%c0_19, %c0_20] : memref<100x30xf32, #tpu.memory_space<vmem>>, vector<100x30xf32>
    %cst_21 = arith.constant dense<0.000000e+00> : vector<8x30xf32>
    %58 = tpu.matmul %56, %57, %cst_21 {dimension_numbers = #tpu.dot_dimension_numbers<[1], [0], [0], [1], [0, 0, 1, 1], [], []>} : vector<8x100xf32>, vector<100x30xf32>, vector<8x30xf32> -> vector<8x30xf32>
    %c0_22 = arith.constant 0 : index
    %c0_23 = arith.constant 0 : index
    %59 = vector.load %arg9[%c0_22, %c0_23] : memref<1x30xf32, #tpu.memory_space<vmem>>, vector<1x30xf32>
    %60 = vector.broadcast %59 : vector<1x30xf32> to vector<8x30xf32>
    %61 = arith.addf %58, %60 : vector<8x30xf32>
    %cst_24 = arith.constant 0.000000e+00 : f32
    %62 = vector.broadcast %cst_24 : f32 to vector<8x30xf32>
    %63 = arith.maximumf %61, %62 : vector<8x30xf32>
    %c0_25 = arith.constant 0 : index
    %c0_26 = arith.constant 0 : index
    %64 = vector.load %arg10[%c0_25, %c0_26] : memref<30x20xf32, #tpu.memory_space<vmem>>, vector<30x20xf32>
    %cst_27 = arith.constant dense<0.000000e+00> : vector<8x20xf32>
    %65 = tpu.matmul %63, %64, %cst_27 {dimension_numbers = #tpu.dot_dimension_numbers<[1], [0], [0], [1], [0, 0, 1, 1], [], []>} : vector<8x30xf32>, vector<30x20xf32>, vector<8x20xf32> -> vector<8x20xf32>
    %c0_28 = arith.constant 0 : index
    %c0_29 = arith.constant 0 : index
    %66 = vector.load %arg11[%c0_28, %c0_29] : memref<1x20xf32, #tpu.memory_space<vmem>>, vector<1x20xf32>
    %67 = vector.broadcast %66 : vector<1x20xf32> to vector<8x20xf32>
    %68 = arith.addf %65, %67 : vector<8x20xf32>
    %c0_30 = arith.constant 0 : index
    %c0_31 = arith.constant 0 : index
    %c0_32 = arith.constant 0 : index
    %69 = vector.load %arg12[%c0_30, %c0_31, %c0_32] : memref<1x8x20xf32, #tpu.memory_space<vmem>>, vector<1x8x20xf32>
    %70 = vector.shape_cast %69 : vector<1x8x20xf32> to vector<8x20xf32>
    %71 = vector.shape_cast %68 : vector<8x20xf32> to vector<1x8x20xf32>
    tpu.vector_store %arg12[%c0_30, %c0_31, %c0_32], %71 {strides = array<i32>} : memref<1x8x20xf32, #tpu.memory_space<vmem>>, vector<1x8x20xf32>,
    return
  }
  func.func @transform_0(%arg0: i32) -> (i32, i32, i32) {
    %c0_i32 = arith.constant 0 : i32
    %c0_i32_0 = arith.constant 0 : i32
    %c0_i32_1 = arith.constant 0 : i32
    return %arg0, %c0_i32, %c0_i32_0 : i32, i32, i32
  }
  func.func @transform_1(%arg0: i32) -> (i32, i32) {
    %c0_i32 = arith.constant 0 : i32
    %c0_i32_0 = arith.constant 0 : i32
    %c0_i32_1 = arith.constant 0 : i32
    return %c0_i32, %c0_i32_0 : i32, i32
  }
  func.func @transform_2(%arg0: i32) -> (i32, i32) {
    %c0_i32 = arith.constant 0 : i32
    %c0_i32_0 = arith.constant 0 : i32
    %c0_i32_1 = arith.constant 0 : i32
    return %c0_i32, %c0_i32_0 : i32, i32
  }
  func.func @transform_3(%arg0: i32) -> (i32, i32) {
    %c0_i32 = arith.constant 0 : i32
    %c0_i32_0 = arith.constant 0 : i32
    %c0_i32_1 = arith.constant 0 : i32
    return %c0_i32, %c0_i32_0 : i32, i32
  }
  func.func @transform_4(%arg0: i32) -> (i32, i32) {
    %c0_i32 = arith.constant 0 : i32
    %c0_i32_0 = arith.constant 0 : i32
    %c0_i32_1 = arith.constant 0 : i32
    return %c0_i32, %c0_i32_0 : i32, i32
  }
  func.func @transform_5(%arg0: i32) -> (i32, i32) {
    %c0_i32 = arith.constant 0 : i32
    %c0_i32_0 = arith.constant 0 : i32
    %c0_i32_1 = arith.constant 0 : i32
    return %c0_i32, %c0_i32_0 : i32, i32
  }
  func.func @transform_6(%arg0: i32) -> (i32, i32) {
    %c0_i32 = arith.constant 0 : i32
    %c0_i32_0 = arith.constant 0 : i32
    %c0_i32_1 = arith.constant 0 : i32
    return %c0_i32, %c0_i32_0 : i32, i32
  }
  func.func @transform_7(%arg0: i32) -> (i32, i32) {
    %c0_i32 = arith.constant 0 : i32
    %c0_i32_0 = arith.constant 0 : i32
    %c0_i32_1 = arith.constant 0 : i32
    return %c0_i32, %c0_i32_0 : i32, i32
  }
  func.func @transform_8(%arg0: i32) -> (i32, i32) {
    %c0_i32 = arith.constant 0 : i32
    %c0_i32_0 = arith.constant 0 : i32
    %c0_i32_1 = arith.constant 0 : i32
    return %c0_i32, %c0_i32_0 : i32, i32
  }
  func.func @transform_9(%arg0: i32) -> (i32, i32) {
    %c0_i32 = arith.constant 0 : i32
    %c0_i32_0 = arith.constant 0 : i32
    %c0_i32_1 = arith.constant 0 : i32
    return %c0_i32, %c0_i32_0 : i32, i32
  }
  func.func @transform_10(%arg0: i32) -> (i32, i32) {
    %c0_i32 = arith.constant 0 : i32
    %c0_i32_0 = arith.constant 0 : i32
    %c0_i32_1 = arith.constant 0 : i32
    return %c0_i32, %c0_i32_0 : i32, i32
  }
  func.func @transform_11(%arg0: i32) -> (i32, i32, i32) {
    %c0_i32 = arith.constant 0 : i32
    %c0_i32_0 = arith.constant 0 : i32
    %c0_i32_1 = arith.constant 0 : i32
    return %arg0, %c0_i32, %c0_i32_0 : i32, i32, i32
  }
}

</mosaic_0001>

<bundles_post_ra>
// kernel: tpu_custom_call.1
= control target key start
LH: loop header
LB: loop body
LE: loop exit
PB: predicated region body
PF: predicated region fallthrough
CT: control target
= control target key end

     0   :  { %vm398_vm0 = vcmask 1044480   ;;  %s3013_s0 = inlined_call_operand.vmem [shape: f32[1,696,45], index: 0, kind: input, shape index: {}]   ;;  %s3014_s1 = inlined_call_operand.vmem [shape: f32[45,10], index: 1, kind: input, shape index: {}]   ;;  %s3015_s2 = inlined_call_operand.vmem [shape: f32[1,10], index: 2, kind: input, shape index: {}]   ;;  %s3016_s3 = inlined_call_operand.vmem [shape: f32[50,10], index: 3, kind: input, shape index: {}]   ;;  %s3017_s4 = inlined_call_operand.vmem [shape: f32[1,10], index: 4, kind: input, shape index: {}]   ;;  %s3018_s5 = inlined_call_operand.vmem [shape: f32[50,100], index: 5, kind: input, shape index: {}]   ;;  %s3019_s6 = inlined_call_operand.vmem [shape: f32[1,100], index: 6, kind: input, shape index: {}]   ;;  %s3020_s7 = inlined_call_operand.vmem [shape: f32[100,30], index: 7, kind: input, shape index: {}]   ;;  %s3021_s8 = inlined_call_operand.vmem [shape: f32[1,30], index: 8, kind: input, shape index: {}]   ;;  %s3022_s9 = inlined_call_operand.vmem [shape: f32[30,20], index: 9, kind: input, shape index: {}]   ;;  %s3023_s10 = inlined_call_operand.vmem [shape: f32[1,20], index: 10, kind: input, shape index: {}]   ;;  %s3024_s11 = inlined_call_operand.hbm [shape: f32[1,8,20], index: 11, kind: output, shape index: {}]  }
   0x1   :  { %v131_v0 = vld [vmem:[%s3014_s1 + $0x28] sm:$0x1f]  ;;  %v130_v1 = vld [vmem:[%s3014_s1 + $0x20] sm:$0xff]  ;;  %v129_v2 = vld [vmem:[%s3014_s1 + $0x18] sm:$0xff] }
   0x2   :  { %1641 = vmatpush.msk.msra.mxu0 %vm398_vm0, %v131_v0  ;;  %1761 = vmatpush.msk.msra.mxu1 %vm398_vm0, %v131_v0  ;;  %v128_v3 = vld [vmem:[%s3014_s1 + $0x10] sm:$0xff]  ;;  %v127_v4 = vld [vmem:[%s3014_s1 + $0x8] sm:$0xff] }
   0x3   :  { %1762 = vmatpush.msk.msra.mxu2 %vm398_vm0, %v131_v0  ;;  %1763 = vmatpush.msk.msra.mxu3 %vm398_vm0, %v131_v0 }
   0x4   :  { %413 = vmatpush.msra.mxu0 %v130_v1  ;;  %1764 = vmatpush.msra.mxu1 %v130_v1 }
   0x5   :  { %1765 = vmatpush.msra.mxu2 %v130_v1  ;;  %1766 = vmatpush.msra.mxu3 %v130_v1 }
   0x6   :  { %414 = vmatpush.msra.mxu0 %v129_v2  ;;  %1767 = vmatpush.msra.mxu1 %v129_v2 }
   0x7   :  { %1768 = vmatpush.msra.mxu2 %v129_v2  ;;  %1769 = vmatpush.msra.mxu3 %v129_v2 }
   0x8   :  { %415 = vmatpush.msra.mxu0 %v128_v3  ;;  %1770 = vmatpush.msra.mxu1 %v128_v3 }
   0x9   :  { %16 = vsyncpa [#allocation3], 0  ;;  %1771 = vmatpush.msra.mxu2 %v128_v3  ;;  %v126_v5 = vld [vmem:[%s3014_s1] sm:$0xff]  ;;  %1772 = vmatpush.msra.mxu3 %v128_v3  ;;  %vm136_vm1 = vcmask 367616   ;;  %v69_v7 = vld [vmem:[%s3013_s0 + $0xf0] sm:$0xff]  ;;  %s1816_s21 = smov 40  }
   0xa   :  { %416 = vmatpush.msra.mxu0 %v127_v4  ;;  %1773 = vmatpush.msra.mxu1 %v127_v4  ;;  %v39_v6 = vld [vmem:[%s3013_s0] sm:$0xff]  ;;  %v40_v9 = vld [vmem:[%s3013_s0 + $0x8] sm:$0xff]  ;;  %v70_v10 = vld [vmem:[%s3013_s0 + $0xf8] sm:$0xff]  ;;  %s1817_s28 = smov 30   ;;  %s1818_s1 = smov 20   ;;  %vm1179_vm2 = vcmask 162816  }
   0xb   :  { %1774 = vmatpush.msra.mxu2 %v127_v4  ;;  %v71_v8 = vld [vmem:[%s3013_s0 + $0x100] sm:$0xff]  ;;  %1775 = vmatpush.msra.mxu3 %v127_v4  ;;  %v72_v11 = vld [vmem:[%s3013_s0 + $0x108] sm:$0xff]  ;;  %v41_v12 = vld [vmem:[%s3013_s0 + $0x10] sm:$0xff]  ;;  %s1819_s23 = smov 10   ;;  %vm1153_vm3 = vcmask 80896   ;;  %vm1344_vm4 = vcmask 1041408  }
   0xc   :  { %417 = vmatpush.msra.mxu0 %v126_v5  ;;  %1776 = vmatpush.msra.mxu1 %v126_v5  ;;  %v73_v13 = vld [vmem:[%s3013_s0 + $0x110] sm:$0xff]  ;;  %v42_v14 = vld [vmem:[%s3013_s0 + $0x18] sm:$0xff]  ;;  %v43_v16 = vld [vmem:[%s3013_s0 + $0x20] sm:$0xff]  ;;  %vm1205_vm5 = vcmask 244736   ;;  %vm1231_vm6 = vcmask 326656   ;;  %vm1268_vm7 = vcmask 408576  }
   0xd   :  { %1777 = vmatpush.msra.mxu2 %v126_v5  ;;  %1642 = vmatmul.msk.f32.vlgmr.msra.gmra.mxu0 %vm136_vm1, %v39_v6  ;;  %v74_v15 = vld [vmem:[%s3013_s0 + $0x118] sm:$0xff]  ;;  %v75_v17 = vld [vmem:[%s3013_s0 + $0x120] sm:$0xff]  ;;  %v44_v18 = vld [vmem:[%s3013_s0 + $0x28] sm:$0xff]  ;;  %vm1564_vm8 = vcmask 1043456   ;;  %vm1600_vm9 = vcmask 1045504   ;;  %vm1560_vm10 = vcmask 818176  }
   0xe   :  { %1672 = vmatmul.msk.f32.vlgmr.msra.gmra.mxu1 %vm136_vm1, %v69_v7  ;;  %1674 = vmatmul.msk.f32.vlgmr.msra.gmra.mxu2 %vm136_vm1, %v71_v8  ;;  %v76_v19 = vld [vmem:[%s3013_s0 + $0x128] sm:$0xff]  ;;  %v45_v20 = vld [vmem:[%s3013_s0 + $0x30] sm:$0xff]  ;;  %v46_v22 = vld [vmem:[%s3013_s0 + $0x38] sm:$0xff]  ;;  %s1820_s27 = smov [#allocation2]  }
   0xf   :  { %1778 = vmatpush.msra.mxu3 %v126_v5  ;;  %v77_v21 = vld [vmem:[%s3013_s0 + $0x130] sm:$0xff]  ;;  %v78_v23 = vld [vmem:[%s3013_s0 + $0x138] sm:$0xff]  ;;  %v47_v24 = vld [vmem:[%s3013_s0 + $0x40] sm:$0xff] }
  0x10   :  { %v79_v25 = vld [vmem:[%s3013_s0 + $0x140] sm:$0xff]  ;;  %v48_v26 = vld [vmem:[%s3013_s0 + $0x48] sm:$0xff]  ;;  %v49_v28 = vld [vmem:[%s3013_s0 + $0x50] sm:$0xff] }
  0x11   :  { %v80_v27 = vld [vmem:[%s3013_s0 + $0x148] sm:$0xff]  ;;  %v81_v29 = vld [vmem:[%s3013_s0 + $0x150] sm:$0xff]  ;;  %v50_v30 = vld [vmem:[%s3013_s0 + $0x58] sm:$0xff] }
  0x12   :  { %v82_v31 = vld [vmem:[%s3013_s0 + $0x158] sm:$0xff]  ;;  %v51_v32 = vld [vmem:[%s3013_s0 + $0x60] sm:$0xff]  ;;  %v52_v34 = vld [vmem:[%s3013_s0 + $0x68] sm:$0xff] }
  0x13   :  { %v83_v33 = vld [vmem:[%s3013_s0 + $0x160] sm:$0xff]  ;;  %v84_v35 = vld [vmem:[%s3013_s0 + $0x168] sm:$0xff]  ;;  %v53_v36 = vld [vmem:[%s3013_s0 + $0x70] sm:$0xff] }
  0x14   :  { %v85_v37 = vld [vmem:[%s3013_s0 + $0x170] sm:$0xff]  ;;  %v98_v38 = vld [vmem:[%s3013_s0 + $0x1d8] sm:$0xff]  ;;  %v99_v41 = vld [vmem:[%s3013_s0 + $0x1e0] sm:$0xff] }
  0x15   :  { %1643 = vmatmul.msk.f32.gmra.mxu0 %vm136_vm1, %v40_v9  ;;  %1701 = vmatmul.msk.f32.vlgmr.msra.gmra.mxu3 %vm136_vm1, %v98_v38  ;;  %v54_v39 = vld [vmem:[%s3013_s0 + $0x78] sm:$0xff]  ;;  %v55_v43 = vld [vmem:[%s3013_s0 + $0x80] sm:$0xff]  ;;  %v100_v46 = vld [vmem:[%s3013_s0 + $0x1e8] sm:$0xff] }
  0x16   :  { %1673 = vmatmul.msk.f32.gmra.mxu1 %vm136_vm1, %v70_v10  ;;  %1675 = vmatmul.msk.f32.gmra.mxu2 %vm136_vm1, %v72_v11  ;;  %v86_v40 = vld [vmem:[%s3013_s0 + $0x178] sm:$0xff]  ;;  %v87_v45 = vld [vmem:[%s3013_s0 + $0x180] sm:$0xff]  ;;  %v56_v52 = vld [vmem:[%s3013_s0 + $0x88] sm:$0xff] }
  0x17   :  { %v2059_v47 = vld [vmem:[%s3015_s2] ss:$0 sm:$0xff]  ;;  %v88_v54 = vld [vmem:[%s3013_s0 + $0x188] sm:$0xff]  ;;  %v101_v55 = vld [vmem:[%s3013_s0 + $0x1f0] sm:$0xff] }
  0x18   :  { %v57_v0 = vld [vmem:[%s3013_s0 + $0x90] sm:$0xff]  ;;  %v102_v2 = vld [vmem:[%s3013_s0 + $0x1f8] sm:$0xff]  ;;  %v103_v9 = vld [vmem:[%s3013_s0 + $0x200] sm:$0xff] }
  0x19   :  { %v89_v1 = vld [vmem:[%s3013_s0 + $0x190] sm:$0xff]  ;;  %v58_v7 = vld [vmem:[%s3013_s0 + $0x98] sm:$0xff] }
  0x1a   :  { %v90_v8 = vld [vmem:[%s3013_s0 + $0x198] sm:$0xff]  ;;  %v61_v38 = vld [vmem:[%s3013_s0 + $0xb0] sm:$0xff] }
  0x1d   :  { %1644 = vmatmul.msk.f32.gmra.mxu0 %vm136_vm1, %v41_v12  ;;  %1702 = vmatmul.msk.f32.gmra.mxu3 %vm136_vm1, %v99_v41 }
  0x1e   :  { %1676 = vmatmul.msk.f32.gmra.mxu2 %vm136_vm1, %v73_v13 }
  0x25   :  { %1645 = vmatmul.msk.f32.gmra.mxu0 %vm136_vm1, %v42_v14  ;;  %1703 = vmatmul.msk.f32.gmra.mxu3 %vm136_vm1, %v100_v46 }
  0x26   :  { %1677 = vmatmul.msk.f32.gmra.mxu2 %vm136_vm1, %v74_v15 }
  0x2d   :  { %1646 = vmatmul.msk.f32.gmra.mxu0 %vm136_vm1, %v43_v16  ;;  %1704 = vmatmul.msk.f32.gmra.mxu3 %vm136_vm1, %v101_v55  ;;  %v59_v16 = vld [vmem:[%s3013_s0 + $0xa0] sm:$0xff] }
  0x2e   :  { %1678 = vmatmul.msk.f32.gmra.mxu2 %vm136_vm1, %v75_v17  ;;  %v91_v17 = vld [vmem:[%s3013_s0 + $0x1a0] sm:$0xff] }
  0x35   :  { %1647 = vmatmul.msk.f32.gmra.mxu0 %vm136_vm1, %v44_v18  ;;  %1705 = vmatmul.msk.f32.gmra.mxu3 %vm136_vm1, %v102_v2  ;;  %v104_v18 = vld [vmem:[%s3013_s0 + $0x208] sm:$0xff] }
  0x36   :  { %1679 = vmatmul.msk.f32.gmra.mxu2 %vm136_vm1, %v76_v19  ;;  %v108_v2 = vld [vmem:[%s3013_s0 + $0x228] sm:$0xff] }
  0x3d   :  { %1648 = vmatmul.msk.f32.gmra.mxu0 %vm136_vm1, %v45_v20  ;;  %1706 = vmatmul.msk.f32.gmra.mxu3 %vm136_vm1, %v103_v9 }
  0x3e   :  { %1680 = vmatmul.msk.f32.gmra.mxu2 %vm136_vm1, %v77_v21 }
  0x45   :  { %1649 = vmatmul.msk.f32.gmra.mxu0 %vm136_vm1, %v46_v22  ;;  %1707 = vmatmul.msk.f32.gmra.mxu3 %vm136_vm1, %v104_v18 }
  0x46   :  { %1681 = vmatmul.msk.f32.gmra.mxu2 %vm136_vm1, %v78_v23 }
  0x4d   :  { %1650 = vmatmul.msk.f32.gmra.mxu0 %vm136_vm1, %v47_v24 }
  0x4e   :  { %1682 = vmatmul.msk.f32.gmra.mxu2 %vm136_vm1, %v79_v25  ;;  %v60_v25 = vld [vmem:[%s3013_s0 + $0xa8] sm:$0xff] }
  0x55   :  { %1651 = vmatmul.msk.f32.gmra.mxu0 %vm136_vm1, %v48_v26 }
  0x56   :  { %1683 = vmatmul.msk.f32.gmra.mxu2 %vm136_vm1, %v80_v27  ;;  %v92_v27 = vld [vmem:[%s3013_s0 + $0x1a8] sm:$0xff] }
  0x5d   :  { %1652 = vmatmul.msk.f32.gmra.mxu0 %vm136_vm1, %v49_v28  ;;  %v105_v28 = vld [vmem:[%s3013_s0 + $0x210] sm:$0xff] }
  0x5e   :  { %1684 = vmatmul.msk.f32.gmra.mxu2 %vm136_vm1, %v81_v29  ;;  %1708 = vmatmul.msk.f32.gmra.mxu3 %vm136_vm1, %v105_v28 }
  0x65   :  { %1653 = vmatmul.msk.f32.gmra.mxu0 %vm136_vm1, %v50_v30 }
  0x66   :  { %1685 = vmatmul.msk.f32.gmra.mxu2 %vm136_vm1, %v82_v31 }
  0x6d   :  { %1654 = vmatmul.msk.f32.gmra.mxu0 %vm136_vm1, %v51_v32 }
  0x6e   :  { %1686 = vmatmul.msk.f32.gmra.mxu2 %vm136_vm1, %v83_v33 }
  0x75   :  { %1655 = vmatmul.msk.f32.gmra.mxu0 %vm136_vm1, %v52_v34 }
  0x76   :  { %1687 = vmatmul.msk.f32.gmra.mxu2 %vm136_vm1, %v84_v35 }
  0x7d   :  { %1656 = vmatmul.msk.f32.gmra.mxu0 %vm136_vm1, %v53_v36 }
  0x7e   :  { %1688 = vmatmul.msk.f32.gmra.mxu2 %vm136_vm1, %v85_v37 }
  0x85   :  { %1657 = vmatmul.msk.f32.gmra.mxu0 %vm136_vm1, %v54_v39  ;;  %v93_v39 = vld [vmem:[%s3013_s0 + $0x1b0] sm:$0xff] }
  0x86   :  { %1689 = vmatmul.msk.f32.gmra.mxu2 %vm136_vm1, %v86_v40  ;;  %v106_v40 = vld [vmem:[%s3013_s0 + $0x218] sm:$0xff] }
  0x87   :  { %1709 = vmatmul.msk.f32.gmra.mxu3 %vm136_vm1, %v106_v40 }
  0x8a   :  { %v2043_v42 = vpop.f32.mrf.mxu0 }
  0x8b   :  { %v509_v44 = vpop.f32.mrf.mxu1 }
  0x8c   :  { %v510_v48 = vadd.f32 %v2059_v47, %v509_v44 }
  0x8d   :  { %1658 = vmatmul.msk.f32.gmra.mxu0 %vm136_vm1, %v55_v43 }
  0x8e   :  { %1690 = vmatmul.msk.f32.gmra.mxu2 %vm136_vm1, %v87_v45  ;;  %v710_v56 = vmax.f32 %v510_v48, 0.0 }
  0x91   :  { %v515_v49 = vpop.f32.mrf.mxu2 }
  0x92   :  { %v516_v50 = vadd.f32 %v2059_v47, %v515_v49  ;;  %v2064_v51 = vpop.f32.mrf.mxu0  ;;  %v62_v49 = vld [vmem:[%s3013_s0 + $0xb8] sm:$0xff] }
  0x93   :  { %v512_v53 = vpop.f32.mrf.mxu1 }
  0x94   :  { %v513_v57 = vadd.f32 %v2059_v47, %v512_v53  ;;  %v712_v58 = vmax.f32 %v516_v50, 0.0  ;;  %v94_v50 = vld [vmem:[%s3013_s0 + $0x1b8] sm:$0xff] }
  0x95   :  { %1659 = vmatmul.msk.f32.gmra.mxu0 %vm136_vm1, %v56_v52  ;;  %v107_v52 = vld [vmem:[%s3013_s0 + $0x220] sm:$0xff] }
  0x96   :  { %v711_v59 = vmax.f32 %v513_v57, 0.0  ;;  %1691 = vmatmul.msk.f32.gmra.mxu2 %vm136_vm1, %v88_v54  ;;  %1710 = vmatmul.msk.f32.gmra.mxu3 %vm136_vm1, %v107_v52 }
  0x98   :  { %v777_v60 = vmax.f32 %v710_v56, %v711_v59 }
  0x99   :  { %v518_v61 = vpop.f32.mrf.mxu2 }
  0x9a   :  { %v2079_v62 = vmax.f32 %v777_v60, %v712_v58  ;;  %v2081_v63 = vpop.f32.mrf.mxu0  ;;  %v519_v4 = vadd.f32 %v2059_v47, %v518_v61  ;;  %v63_v60 = vld [vmem:[%s3013_s0 + $0xc0] sm:$0xff] }
  0x9c   :  { %1090 = vrot.lane.b32.xlu0 %v2079_v62, %s1816_s21  ;;  %v713_v10 = vmax.f32 %v519_v4, 0.0 }
  0x9d   :  { %1660 = vmatmul.msk.f32.gmra.mxu0 %vm136_vm1, %v57_v0 }
  0x9e   :  { %1692 = vmatmul.msk.f32.gmra.mxu2 %vm136_vm1, %v89_v1  ;;  %v95_v1 = vld [vmem:[%s3013_s0 + $0x1c0] sm:$0xff]  ;;  %1711 = vmatmul.msk.f32.gmra.mxu3 %vm136_vm1, %v108_v2  ;;  %v114_v2 = vld [vmem:[%s3013_s0 + $0x258] sm:$0xff] }
  0xa1   :  { %v521_v3 = vpop.f32.mrf.mxu2 }
  0xa2   :  { %v522_v5 = vadd.f32 %v2059_v47, %v521_v3  ;;  %v428_v6 = vpop.f32.mrf.mxu0 }
  0xa3   :  { %v429_v23 = vadd.f32 %v2059_v47, %v428_v6 }
  0xa4   :  { %1016 = vrot.lane.b32.xlu0 %v2079_v62, %s1817_s28  ;;  %v714_v11 = vmax.f32 %v522_v5, 0.0 }
  0xa5   :  { %1661 = vmatmul.msk.f32.gmra.mxu0 %vm136_vm1, %v58_v7  ;;  %v683_v30 = vmax.f32 %v429_v23, 0.0 }
  0xa6   :  { %1693 = vmatmul.msk.f32.gmra.mxu2 %vm136_vm1, %v90_v8  ;;  %v778_v13 = vmax.f32 %v713_v10, %v714_v11  ;;  %v64_v10 = vld [vmem:[%s3013_s0 + $0xc8] sm:$0xff] }
  0xa7   :  { %v96_v11 = vld [vmem:[%s3013_s0 + $0x1c8] sm:$0xff] }
  0xa9   :  { %v524_v12 = vpop.f32.mrf.mxu2 }
  0xaa   :  { %v525_v14 = vadd.f32 %v2059_v47, %v524_v12  ;;  %v431_v15 = vpop.f32.mrf.mxu0  ;;  %v109_v12 = vld [vmem:[%s3013_s0 + $0x230] sm:$0xff] }
  0xab   :  { %v432_v21 = vadd.f32 %v2059_v47, %v431_v15  ;;  %1712 = vmatmul.msk.f32.gmra.mxu3 %vm136_vm1, %v109_v12 }
  0xac   :  { %v715_v19 = vmax.f32 %v525_v14, 0.0  ;;  %942 = vrot.lane.b32.xlu0 %v2079_v62, %s1818_s1 }
  0xad   :  { %1662 = vmatmul.msk.f32.gmra.mxu0 %vm136_vm1, %v59_v16  ;;  %v684_v29 = vmax.f32 %v432_v21, 0.0  ;;  %v97_v21 = vld [vmem:[%s3013_s0 + $0x1d0] sm:$0xff] }
  0xae   :  { %v2127_v20 = vmax.f32 %v778_v13, %v715_v19  ;;  %1694 = vmatmul.msk.f32.gmra.mxu2 %vm136_vm1, %v91_v17  ;;  %v65_v19 = vld [vmem:[%s3013_s0 + $0xd0] sm:$0xff] }
  0xaf   :  { %v768_v32 = vmax.f32 %v683_v30, %v684_v29  ;;  %v66_v30 = vld [vmem:[%s3013_s0 + $0xd8] sm:$0xff] }
  0xb0   :  { %1092 = vrot.lane.b32.xlu1 %v2127_v20, %s1816_s21 }
  0xb1   :  { %v527_v22 = vpop.f32.mrf.mxu2 }
  0xb2   :  { %v434_v24 = vpop.f32.mrf.mxu0  ;;  %v528_v34 = vadd.f32 %v2059_v47, %v527_v22  ;;  %v110_v22 = vld [vmem:[%s3013_s0 + $0x238] sm:$0xff] }
  0xb3   :  { %v435_v26 = vadd.f32 %v2059_v47, %v434_v24  ;;  %1713 = vmatmul.msk.f32.gmra.mxu3 %vm136_vm1, %v110_v22 }
  0xb4   :  { %868 = vrot.lane.b32.xlu0 %v2079_v62, %s1819_s23  ;;  %v716_v41 = vmax.f32 %v528_v34, 0.0 }
  0xb5   :  { %1663 = vmatmul.msk.f32.gmra.mxu0 %vm136_vm1, %v60_v25  ;;  %v685_v31 = vmax.f32 %v435_v26, 0.0 }
  0xb6   :  { %1695 = vmatmul.msk.f32.gmra.mxu2 %vm136_vm1, %v92_v27 }
  0xb7   :  { %v2153_v37 = vmax.f32 %v768_v32, %v685_v31 }
  0xb8   :  { %1018 = vrot.lane.b32.xlu1 %v2127_v20, %s1817_s28 }
  0xb9   :  { %v530_v33 = vpop.f32.mrf.mxu2 }
  0xba   :  { %v531_v35 = vadd.f32 %v2059_v47, %v530_v33  ;;  %v437_v36 = vpop.f32.mrf.mxu0  ;;  %v111_v33 = vld [vmem:[%s3013_s0 + $0x240] sm:$0xff] }
  0xbb   :  { %v438_v56 = vadd.f32 %v2059_v47, %v437_v36  ;;  %1714 = vmatmul.msk.f32.gmra.mxu3 %vm136_vm1, %v111_v33 }
  0xbc   :  { %850 = vrot.lane.b32.xlu0 %v2153_v37, %s1819_s23  ;;  %v717_v43 = vmax.f32 %v531_v35, 0.0 }
  0xbd   :  { %1664 = vmatmul.msk.f32.gmra.mxu0 %vm136_vm1, %v61_v38  ;;  %v686_v61 = vmax.f32 %v438_v56, 0.0 }
  0xbe   :  { %1696 = vmatmul.msk.f32.gmra.mxu2 %vm136_vm1, %v93_v39  ;;  %v779_v45 = vmax.f32 %v716_v41, %v717_v43  ;;  %v67_v43 = vld [vmem:[%s3013_s0 + $0xe0] sm:$0xff] }
  0xc0   :  { %944 = vrot.lane.b32.xlu1 %v2127_v20, %s1818_s1 }
  0xc1   :  { %v533_v44 = vpop.f32.mrf.mxu2 }
  0xc2   :  { %v534_v46 = vadd.f32 %v2059_v47, %v533_v44  ;;  %v440_v48 = vpop.f32.mrf.mxu0  ;;  %v112_v44 = vld [vmem:[%s3013_s0 + $0x248] sm:$0xff] }
  0xc3   :  { %v441_v54 = vadd.f32 %v2059_v47, %v440_v48  ;;  %1715 = vmatmul.msk.f32.gmra.mxu3 %vm136_vm1, %v112_v44 }
  0xc4   :  { %v718_v53 = vmax.f32 %v534_v46, 0.0 }
  0xc5   :  { %1665 = vmatmul.msk.f32.gmra.mxu0 %vm136_vm1, %v62_v49  ;;  %v687_v57 = vmax.f32 %v441_v54, 0.0  ;;  %v113_v54 = vld [vmem:[%s3013_s0 + $0x250] sm:$0xff] }
  0xc6   :  { %v2184_v55 = vmax.f32 %v779_v45, %v718_v53  ;;  %1697 = vmatmul.msk.f32.gmra.mxu2 %vm136_vm1, %v94_v50  ;;  %v68_v53 = vld [vmem:[%s3013_s0 + $0xe8] sm:$0xff] }
  0xc7   :  { %v769_v3 = vmax.f32 %v686_v61, %v687_v57 }
  0xc8   :  { %1094 = vrot.lane.b32.xlu2 %v2184_v55, %s1816_s21  ;;  %870 = vrot.lane.b32.xlu1 %v2127_v20, %s1819_s23 }
  0xc9   :  { %v536_v58 = vpop.f32.mrf.mxu2 }
  0xca   :  { %v443_v59 = vpop.f32.mrf.mxu0  ;;  %v537_v7 = vadd.f32 %v2059_v47, %v536_v58 }
  0xcb   :  { %v444_v0 = vadd.f32 %v2059_v47, %v443_v59  ;;  %1716 = vmatmul.msk.f32.gmra.mxu3 %vm136_vm1, %v113_v54 }
  0xcc   :  { %v719_v13 = vmax.f32 %v537_v7, 0.0  ;;  %v2301_v7 = vpop.f32.mrf.mxu3 }
  0xcd   :  { %v688_v4 = vmax.f32 %v444_v0, 0.0  ;;  %1666 = vmatmul.msk.f32.gmra.mxu0 %vm136_vm1, %v63_v60 }
  0xce   :  { %1698 = vmatmul.msk.f32.gmra.mxu2 %vm136_vm1, %v95_v1 }
  0xcf   :  { %v2205_v5 = vmax.f32 %v769_v3, %v688_v4 }
  0xd0   :  { %1020 = vrot.lane.b32.xlu2 %v2184_v55, %s1817_s28 }
  0xd1   :  { %v539_v6 = vpop.f32.mrf.mxu2  ;;  %926 = vrot.lane.b32.xlu0 %v2205_v5, %s1818_s1 }
  0xd2   :  { %v540_v8 = vadd.f32 %v2059_v47, %v539_v6  ;;  %v446_v9 = vpop.f32.mrf.mxu0 }
  0xd3   :  { %v447_v26 = vadd.f32 %v2059_v47, %v446_v9  ;;  %1717 = vmatmul.msk.f32.gmra.mxu3 %vm136_vm1, %v114_v2  ;;  %v115_v9 = vld [vmem:[%s3013_s0 + $0x260] sm:$0xff] }
  0xd4   :  { %v720_v14 = vmax.f32 %v540_v8, 0.0 }
  0xd5   :  { %1667 = vmatmul.msk.f32.gmra.mxu0 %vm136_vm1, %v64_v10  ;;  %v689_v31 = vmax.f32 %v447_v26, 0.0  ;;  %v599_v10 = vpop.f32.mrf.mxu3 }
  0xd6   :  { %1699 = vmatmul.msk.f32.gmra.mxu2 %vm136_vm1, %v96_v11  ;;  %v780_v16 = vmax.f32 %v719_v13, %v720_v14  ;;  %v116_v13 = vld [vmem:[%s3013_s0 + $0x268] sm:$0xff]  ;;  %v600_v14 = vadd.f32 %v2059_v47, %v599_v10 }
  0xd8   :  { %946 = vrot.lane.b32.xlu2 %v2184_v55, %s1818_s1 }
  0xd9   :  { %v542_v15 = vpop.f32.mrf.mxu2 }
  0xda   :  { %v543_v17 = vadd.f32 %v2059_v47, %v542_v15  ;;  %v449_v18 = vpop.f32.mrf.mxu0 }
  0xdb   :  { %v450_v24 = vadd.f32 %v2059_v47, %v449_v18  ;;  %1718 = vmatmul.msk.f32.gmra.mxu3 %vm136_vm1, %v115_v9  ;;  %v740_v18 = vmax.f32 %v600_v14, 0.0 }
  0xdc   :  { %v721_v23 = vmax.f32 %v543_v17, 0.0 }
  0xdd   :  { %1668 = vmatmul.msk.f32.gmra.mxu0 %vm136_vm1, %v65_v19  ;;  %v690_v27 = vmax.f32 %v450_v24, 0.0  ;;  %v602_v17 = vpop.f32.mrf.mxu3 }
  0xde   :  { %v2240_v25 = vmax.f32 %v780_v16, %v721_v23  ;;  %1700 = vmatmul.msk.f32.gmra.mxu2 %vm136_vm1, %v97_v21  ;;  %v603_v19 = vadd.f32 %v2059_v47, %v602_v17 }
  0xdf   :  { %v770_v34 = vmax.f32 %v689_v31, %v690_v27 }
  0xe0   :  { %872 = vrot.lane.b32.xlu2 %v2184_v55, %s1819_s23  ;;  %1096 = vrot.lane.b32.xlu0 %v2240_v25, %s1816_s21  ;;  %v741_v24 = vmax.f32 %v603_v19, 0.0 }
  0xe1   :  { %v545_v28 = vpop.f32.mrf.mxu2 }
  0xe2   :  { %v452_v29 = vpop.f32.mrf.mxu0  ;;  %v546_v39 = vadd.f32 %v2059_v47, %v545_v28  ;;  %v117_v28 = vld [vmem:[%s3013_s0 + $0x270] sm:$0xff] }
  0xe3   :  { %v453_v32 = vadd.f32 %v2059_v47, %v452_v29  ;;  %1719 = vmatmul.msk.f32.gmra.mxu3 %vm136_vm1, %v116_v13  ;;  %v787_v29 = vmax.f32 %v740_v18, %v741_v24  ;;  %v121_v24 = vld [vmem:[%s3013_s0 + $0x290] sm:$0xff] }
  0xe4   :  { %v722_v45 = vmax.f32 %v546_v39, 0.0 }
  0xe5   :  { %v691_v35 = vmax.f32 %v453_v32, 0.0  ;;  %1669 = vmatmul.msk.f32.gmra.mxu0 %vm136_vm1, %v66_v30  ;;  %v605_v33 = vpop.f32.mrf.mxu3 }
  0xe7   :  { %v2257_v36 = vmax.f32 %v770_v34, %v691_v35  ;;  %v606_v34 = vadd.f32 %v2059_v47, %v605_v33 }
  0xe8   :  { %852 = vrot.lane.b32.xlu2 %v2205_v5, %s1819_s23  ;;  %1022 = vrot.lane.b32.xlu0 %v2240_v25, %s1817_s28 }
  0xe9   :  { %v548_v38 = vpop.f32.mrf.mxu2  ;;  %1002 = vrot.lane.b32.xlu1 %v2257_v36, %s1817_s28  ;;  %v742_v39 = vmax.f32 %v606_v34, 0.0 }
  0xea   :  { %v549_v40 = vadd.f32 %v2059_v47, %v548_v38  ;;  %v455_v41 = vpop.f32.mrf.mxu0 }
  0xeb   :  { %v456_v59 = vadd.f32 %v2059_v47, %v455_v41  ;;  %1720 = vmatmul.msk.f32.gmra.mxu3 %vm136_vm1, %v117_v28 }
  0xec   :  { %v723_v46 = vmax.f32 %v549_v40, 0.0  ;;  %v118_v40 = vld [vmem:[%s3013_s0 + $0x278] sm:$0xff] }
  0xed   :  { %1670 = vmatmul.msk.f32.gmra.mxu0 %vm136_vm1, %v67_v43  ;;  %v692_v0 = vmax.f32 %v456_v59, 0.0  ;;  %v2344_v43 = vmax.f32 %v787_v29, %v742_v39  ;;  %v608_v44 = vpop.f32.mrf.mxu3 }
  0xee   :  { %v781_v49 = vmax.f32 %v722_v45, %v723_v46 }
  0xf0   :  { %928 = vrot.lane.b32.xlu2 %v2257_v36, %s1818_s1 }
  0xf1   :  { %v551_v48 = vpop.f32.mrf.mxu2 }
  0xf2   :  { %v552_v50 = vadd.f32 %v2059_v47, %v551_v48  ;;  %v458_v52 = vpop.f32.mrf.mxu0  ;;  %v119_v48 = vld [vmem:[%s3013_s0 + $0x280] sm:$0xff] }
  0xf3   :  { %v459_v57 = vadd.f32 %v2059_v47, %v458_v52  ;;  %1721 = vmatmul.msk.f32.gmra.mxu3 %vm136_vm1, %v118_v40 }
  0xf4   :  { %v724_v56 = vmax.f32 %v552_v50, 0.0 }
  0xf5   :  { %1671 = vmatmul.msk.f32.gmra.mxu0 %vm136_vm1, %v68_v53  ;;  %v693_v60 = vmax.f32 %v459_v57, 0.0  ;;  %v611_v54 = vpop.f32.mrf.mxu3  ;;  %v609_v57 = vadd.f32 %v2059_v47, %v608_v44 }
  0xf6   :  { %v2287_v58 = vmax.f32 %v781_v49, %v724_v56  ;;  %v612_v59 = vadd.f32 %v2059_v47, %v611_v54 }
  0xf7   :  { %v771_v3 = vmax.f32 %v692_v0, %v693_v60 }
  0xf8   :  { %1098 = vrot.lane.b32.xlu1 %v2287_v58, %s1816_s21  ;;  %854 = vrot.lane.b32.xlu2 %v2257_v36, %s1819_s23 }
  0xf9   :  { %v2311_v11 = vpop.f32.mrf.mxu2 }
  0xfa   :  { %v461_v61 = vpop.f32.mrf.mxu0 }
  0xfb   :  { %v462_v1 = vadd.f32 %v2059_v47, %v461_v61  ;;  %1722 = vmatmul.msk.f32.gmra.mxu3 %vm136_vm1, %v119_v48 }
  0xfd   :  { %v694_v4 = vmax.f32 %v462_v1, 0.0  ;;  %v120_v1 = vld [vmem:[%s3013_s0 + $0x288] sm:$0xff]  ;;  %v614_v13 = vpop.f32.mrf.mxu3 }
  0xfe   :  { %v615_v17 = vadd.f32 %v2059_v47, %v614_v13 }
  0xff   :  { %v2299_v6 = vmax.f32 %v771_v3, %v694_v4  ;;  %v743_v4 = vmax.f32 %v609_v57, 0.0 }
 0x101   :  { %1078 = vrot.lane.b32.xlu1 %v2299_v6, %s1816_s21  ;;  %1004 = vrot.lane.b32.xlu0 %v2299_v6, %s1817_s28  ;;  %v2325_v22 = vpop.f32.mrf.mxu2 }
 0x102   :  { %v464_v8 = vpop.f32.mrf.mxu0 }
 0x103   :  { %v465_v16 = vadd.f32 %v2059_v47, %v464_v8  ;;  %v744_v8 = vmax.f32 %v612_v59, 0.0  ;;  %1723 = vmatmul.msk.f32.gmra.mxu3 %vm136_vm1, %v120_v1  ;;  %v555_v59 = vadd.f32 %v2059_v47, %v2311_v11  ;;  %v123_v1 = vld [vmem:[%s3013_s0 + $0x2a0] sm:$0xff] }
 0x105   :  { %v695_v26 = vmax.f32 %v465_v16, 0.0  ;;  %v788_v16 = vmax.f32 %v743_v4, %v744_v8  ;;  %v725_v13 = vmax.f32 %v555_v59, 0.0 }
 0x109   :  { %930 = vrot.lane.b32.xlu0 %v2299_v6, %s1818_s1  ;;  %v2342_v41 = vpop.f32.mrf.mxu2 }
 0x10a   :  { %v467_v12 = vpop.f32.mrf.mxu0 }
 0x10b   :  { %v468_v15 = vadd.f32 %v2059_v47, %v467_v12  ;;  %1724 = vmatmul.msk.f32.gmra.mxu3 %vm136_vm1, %v121_v24 }
 0x10d   :  { %v696_v21 = vmax.f32 %v468_v15, 0.0 }
 0x10e   :  { %v2337_v35 = vpop.permute.xlu0 %1090 }
 0x10f   :  { %v772_v30 = vmax.f32 %v695_v26, %v696_v21  ;;  %v745_v21 = vmax.f32 %v615_v17, 0.0 }
 0x111   :  { %856 = vrot.lane.b32.xlu0 %v2299_v6, %s1819_s23  ;;  %v2357_v50 = vpop.f32.mrf.mxu2  ;;  %v2392_v26 = vmax.f32 %v788_v16, %v745_v21 }
 0x112   :  { %v470_v23 = vpop.f32.mrf.mxu0 }
 0x113   :  { %v471_v27 = vadd.f32 %v2059_v47, %v470_v23 }
 0x115   :  { %v697_v31 = vmax.f32 %v471_v27, 0.0  ;;  %v617_v27 = vpop.f32.mrf.mxu3 }
 0x116   :  { %v2354_v49 = vpop.permute.xlu0 %1016  ;;  %v618_v39 = vadd.f32 %v2059_v47, %v617_v27  ;;  %v1262_v27 = vld [vmem:[%s3016_s3 + $0x28] sm:$0xff] }
 0x117   :  { %v2332_v32 = vmax.f32 %v772_v30, %v697_v31 }
 0x119   :  { %1080 = vrot.lane.b32.xlu1 %v2332_v32, %s1816_s21  ;;  %v2376_v14 = vpop.f32.mrf.mxu2 }
 0x11a   :  { %v473_v38 = vpop.f32.mrf.mxu0 }
 0x11b   :  { %v474_v56 = vadd.f32 %v2059_v47, %v473_v38  ;;  %v122_v38 = vld [vmem:[%s3013_s0 + $0x298] sm:$0xff] }
 0x11c   :  { %1725 = vmatmul.msk.f32.gmra.mxu3 %vm136_vm1, %v122_v38 }
 0x11d   :  { %v698_v2 = vmax.f32 %v474_v56, 0.0 }
 0x11e   :  { %v2374_v9 = vpop.permute.xlu0 %942 }
 0x121   :  { %1006 = vrot.lane.b32.xlu1 %v2332_v32, %s1817_s28  ;;  %v2397_v29 = vpop.f32.mrf.mxu2 }
 0x122   :  { %v2349_v45 = vpop.permute.xlu1 %1092  ;;  %v476_v46 = vpop.f32.mrf.mxu0 }
 0x123   :  { %v477_v52 = vadd.f32 %v2059_v47, %v476_v46  ;;  %v2360_v53 = vpop.permute.xlu2 %1094  ;;  %v620_v46 = vpop.f32.mrf.mxu3 }
 0x124   :  { %1726 = vmatmul.msk.f32.gmra.mxu3 %vm136_vm1, %v123_v1  ;;  %v1257_v1 = vld [vmem:[%s3016_s3] sm:$0xff] }
 0x125   :  { %v699_v60 = vmax.f32 %v477_v52, 0.0  ;;  %v746_v52 = vmax.f32 %v618_v39, 0.0  ;;  %v1261_v39 = vld [vmem:[%s3016_s3 + $0x20] sm:$0xff] }
 0x126   :  { %v2395_v28 = vpop.permute.xlu0 %868 }
 0x127   :  { %v773_v10 = vmax.f32 %v698_v2, %v699_v60  ;;  %v558_v60 = vadd.f32 %v2059_v47, %v2325_v22  ;;  %v561_v22 = vadd.f32 %v2059_v47, %v2342_v41 }
 0x129   :  { %932 = vrot.lane.b32.xlu1 %v2332_v32, %s1818_s1  ;;  %v2425_v2 = vpop.f32.mrf.mxu2  ;;  %v726_v11 = vmax.f32 %v558_v60, 0.0  ;;  %v125_v60 = vld [vmem:[%s3013_s0 + $0x2b0] sm:$0xff] }
 0x12a   :  { %v2367_v61 = vpop.permute.xlu1 %1018  ;;  %v479_v0 = vpop.f32.mrf.mxu0 }
 0x12b   :  { %v480_v3 = vadd.f32 %v2059_v47, %v479_v0  ;;  %v2381_v18 = vpop.permute.xlu2 %1020  ;;  %v623_v16 = vpop.f32.mrf.mxu3 }
 0x12c   :  { %v624_v21 = vadd.f32 %v2059_v47, %v623_v16 }
 0x12d   :  { %v700_v12 = vmax.f32 %v480_v3, 0.0 }
 0x12e   :  { %v2414_v54 = vpop.permute.xlu0 %850  ;;  %v748_v41 = vmax.f32 %v624_v21, 0.0 }
 0x12f   :  { %v2378_v15 = vmax.f32 %v773_v10, %v700_v12 }
 0x131   :  { %858 = vrot.lane.b32.xlu1 %v2332_v32, %s1819_s23  ;;  %1082 = vrot.lane.b32.xlu2 %v2378_v15, %s1816_s21 }
 0x132   :  { %v2385_v19 = vpop.permute.xlu1 %944  ;;  %v482_v23 = vpop.f32.mrf.mxu0 }
 0x133   :  { %v947_v31 = vpop.permute.xlu2 %946  ;;  %v483_v48 = vadd.f32 %v2059_v47, %v482_v23  ;;  %v1263_v23 = vld [vmem:[%s3016_s3 + $0x30] sm:$0x3] }
 0x134   :  { %1729 = vmatpush.msk.msrb.mxu1 %vm1344_vm4, %v1263_v23 }
 0x135   :  { %v701_v3 = vmax.f32 %v483_v48, 0.0  ;;  %v626_v48 = vpop.f32.mrf.mxu3 }
 0x136   :  { %1358 = vmatpush.msrb.mxu1 %v1262_v27 }
 0x138   :  { %1359 = vmatpush.msrb.mxu1 %v1261_v39 }
 0x139   :  { %1008 = vrot.lane.b32.xlu2 %v2378_v15, %s1817_s28 }
 0x13a   :  { %v871_v30 = vpop.permute.xlu1 %870  ;;  %v485_v34 = vpop.f32.mrf.mxu0 }
 0x13b   :  { %v1164_v33 = vsel %vm1153_vm3, %v2079_v62, %v871_v30  ;;  %v486_v44 = vadd.f32 %v2059_v47, %v485_v34  ;;  %v621_v62 = vadd.f32 %v2059_v47, %v620_v46  ;;  %v727_v34 = vmax.f32 %v561_v22, 0.0  ;;  %v1260_v46 = vld [vmem:[%s3016_s3 + $0x18] sm:$0xff] }
 0x13c   :  { %v2408_v40 = vsel %vm1179_vm2, %v1164_v33, %v947_v31  ;;  %v124_v31 = vld [vmem:[%s3013_s0 + $0x2a8] sm:$0xff]  ;;  %v782_v33 = vmax.f32 %v725_v13, %v726_v11  ;;  %1360 = vmatpush.msrb.mxu1 %v1260_v46 }
 0x13d   :  { %v702_v56 = vmax.f32 %v486_v44, 0.0  ;;  %v747_v57 = vmax.f32 %v621_v62, 0.0  ;;  %1727 = vmatmul.msk.f32.gmra.mxu3 %vm136_vm1, %v124_v31  ;;  %v2456_v44 = vpop.f32.mrf.mxu2  ;;  %v1259_v62 = vld [vmem:[%s3016_s3 + $0x10] sm:$0xff] }
 0x13e   :  { %1361 = vmatpush.msrb.mxu1 %v1259_v62 }
 0x13f   :  { %v789_v8 = vmax.f32 %v746_v52, %v747_v57  ;;  %v774_v10 = vmax.f32 %v701_v3, %v702_v56  ;;  %v2461_v52 = vmax.f32 %v782_v33, %v727_v34  ;;  %v1258_v57 = vld [vmem:[%s3016_s3 + $0x8] sm:$0xff] }
 0x140   :  { %1362 = vmatpush.msrb.mxu1 %v1258_v57 }
 0x141   :  { %934 = vrot.lane.b32.xlu2 %v2378_v15, %s1818_s1  ;;  %v2450_v38 = vmax.f32 %v789_v8, %v748_v41 }
 0x142   :  { %v488_v0 = vpop.f32.mrf.mxu0  ;;  %1363 = vmatpush.msrb.mxu1 %v1257_v1  ;;  %v426_v1 = vadd.f32 %v2059_v47, %v2081_v63 }
 0x143   :  { %v489_v4 = vadd.f32 %v2059_v47, %v488_v0  ;;  %v2438_v24 = vpop.permute.xlu0 %926  ;;  %v627_v0 = vadd.f32 %v2059_v47, %v626_v48 }
 0x145   :  { %v703_v12 = vmax.f32 %v489_v4, 0.0  ;;  %1728 = vmatmul.msk.f32.gmra.mxu3 %vm136_vm1, %v125_v60  ;;  %v629_v4 = vpop.f32.mrf.mxu3  ;;  %v2484_v8 = vpop.f32.mrf.mxu2 }
 0x146   :  { %v630_v13 = vadd.f32 %v2059_v47, %v629_v4 }
 0x147   :  { %v2431_v17 = vmax.f32 %v774_v10, %v703_v12  ;;  %v749_v12 = vmax.f32 %v627_v0, 0.0  ;;  %v420_v0 = vadd.f32 %v2059_v47, %v2043_v42 }
 0x148   :  { %v750_v22 = vmax.f32 %v630_v13, 0.0 }
 0x149   :  { %860 = vrot.lane.b32.xlu2 %v2378_v15, %s1819_s23  ;;  %1084 = vrot.lane.b32.xlu0 %v2431_v17, %s1816_s21 }
 0x14a   :  { %v491_v30 = vpop.f32.mrf.mxu0  ;;  %v790_v31 = vmax.f32 %v749_v12, %v750_v22  ;;  %v682_v12 = vmax.f32 %v426_v1, 0.0  ;;  %v564_v22 = vadd.f32 %v2059_v47, %v2357_v50  ;;  %v570_v50 = vadd.f32 %v2059_v47, %v2397_v29 }
 0x14b   :  { %v492_v10 = vadd.f32 %v2059_v47, %v491_v30 }
 0x14d   :  { %v704_v41 = vmax.f32 %v492_v10, 0.0  ;;  %v632_v34 = vpop.f32.mrf.mxu3  ;;  %v2496_v48 = vpop.f32.mrf.mxu2  ;;  %v680_v10 = vmax.f32 %v420_v0, 0.0 }
 0x14e   :  { %v633_v46 = vadd.f32 %v2059_v47, %v632_v34 }
 0x151   :  { %1100 = vrot.lane.b32.xlu2 %v2461_v52, %s1816_s21  ;;  %1010 = vrot.lane.b32.xlu0 %v2431_v17, %s1817_s28 }
 0x152   :  { %v2470_v56 = vpop.permute.xlu0 %1096  ;;  %v494_v59 = vpop.f32.mrf.mxu0 }
 0x153   :  { %v495_v3 = vadd.f32 %v2059_v47, %v494_v59  ;;  %v423_v59 = vadd.f32 %v2059_v47, %v2064_v51 }
 0x155   :  { %v705_v11 = vmax.f32 %v495_v3, 0.0  ;;  %v635_v3 = vpop.f32.mrf.mxu3  ;;  %v681_v4 = vmax.f32 %v423_v59, 0.0 }
 0x156   :  { %v636_v63 = vadd.f32 %v2059_v47, %v635_v3 }
 0x157   :  { %v775_v33 = vmax.f32 %v704_v41, %v705_v11  ;;  %v767_v42 = vmax.f32 %v680_v10, %v681_v4 }
 0x158   :  { %v752_v34 = vmax.f32 %v636_v63, 0.0 }
 0x159   :  { %936 = vrot.lane.b32.xlu0 %v2431_v17, %s1818_s1  ;;  %v796_v41 = vmax.f32 %v767_v42, %v682_v12 }
 0x15a   :  { %v1023_v16 = vpop.permute.xlu0 %1022  ;;  %v497_v23 = vpop.f32.mrf.mxu0 }
 0x15b   :  { %v1216_v21 = vsel %vm1205_vm5, %v2408_v40, %v1023_v16  ;;  %v498_v27 = vadd.f32 %v2059_v47, %v497_v23  ;;  %v1003_v62 = vpop.permute.xlu1 %1002  ;;  %v751_v40 = vmax.f32 %v633_v46, 0.0  ;;  %v2517_v16 = vpop.f32.mrf.mxu2  ;;  %v567_v23 = vadd.f32 %v2059_v47, %v2376_v14 }
 0x15d   :  { %v706_v30 = vmax.f32 %v498_v27, 0.0  ;;  %v2504_v60 = vmax.f32 %v790_v31, %v751_v40  ;;  %v2524_v27 = vpop.permute.xlu2 %872  ;;  %v728_v40 = vmax.f32 %v564_v22, 0.0  ;;  %v729_v59 = vmax.f32 %v567_v23, 0.0 }
 0x15f   :  { %v2493_v39 = vmax.f32 %v775_v33, %v706_v30  ;;  %v1154_v30 = vsel %vm1153_vm3, %v796_v41, %v2414_v54 }
 0x160   :  { %v1180_v14 = vsel %vm1179_vm2, %v1154_v30, %v2438_v24  ;;  %v783_v24 = vmax.f32 %v728_v40, %v729_v59 }
 0x161   :  { %1086 = vrot.lane.b32.xlu1 %v2493_v39, %s1816_s21  ;;  %862 = vrot.lane.b32.xlu0 %v2431_v17, %s1819_s23 }
 0x162   :  { %v500_v57 = vpop.f32.mrf.mxu0 }
 0x163   :  { %v501_v31 = vadd.f32 %v2059_v47, %v500_v57  ;;  %v1206_v57 = vsel %vm1205_vm5, %v1180_v14, %v1003_v62 }
 0x165   :  { %v707_v0 = vmax.f32 %v501_v31, 0.0  ;;  %v853_v23 = vpop.permute.xlu2 %852 }
 0x169   :  { %1012 = vrot.lane.b32.xlu1 %v2493_v39, %s1817_s28  ;;  %948 = vrot.lane.b32.xlu0 %v2240_v25, %s1818_s1 }
 0x16a   :  { %v1099_v13 = vpop.permute.xlu1 %1098  ;;  %v503_v51 = vpop.f32.mrf.mxu0 }
 0x16b   :  { %v2515_v11 = vsel %vm1231_vm6, %v1216_v21, %v1099_v13  ;;  %v504_v33 = vadd.f32 %v2059_v47, %v503_v51  ;;  %v638_v21 = vpop.f32.mrf.mxu3  ;;  %v730_v13 = vmax.f32 %v570_v50, 0.0  ;;  %v2543_v51 = vpop.f32.mrf.mxu2 }
 0x16c   :  { %v639_v46 = vadd.f32 %v2059_v47, %v638_v21 }
 0x16d   :  { %v708_v1 = vmax.f32 %v504_v33, 0.0  ;;  %v2546_v31 = vmax.f32 %v783_v24, %v730_v13  ;;  %v929_v14 = vpop.permute.xlu2 %928  ;;  %v579_v13 = vadd.f32 %v2059_v47, %v2484_v8 }
 0x16e   :  { %v753_v54 = vmax.f32 %v639_v46, 0.0 }
 0x16f   :  { %v776_v42 = vmax.f32 %v707_v0, %v708_v1 }
 0x170   :  { %v791_v12 = vmax.f32 %v752_v34, %v753_v54 }
 0x171   :  { %938 = vrot.lane.b32.xlu1 %v2493_v39, %s1818_s1  ;;  %874 = vrot.lane.b32.xlu0 %v2240_v25, %s1819_s23 }
 0x172   :  { %v506_v3 = vpop.f32.mrf.mxu0 }
 0x173   :  { %v1079_v4 = vpop.permute.xlu1 %1078  ;;  %v507_v10 = vadd.f32 %v2059_v47, %v506_v3  ;;  %v641_v22 = vpop.f32.mrf.mxu3 }
 0x174   :  { %v1232_v29 = vsel %vm1231_vm6, %v1206_v57, %v1079_v4  ;;  %v642_v62 = vadd.f32 %v2059_v47, %v641_v22  ;;  %v590_v50 = vpop.f32.mrf.mxu2  ;;  %v573_v57 = vadd.f32 %v2059_v47, %v2425_v2 }
 0x175   :  { %1730 = vmatmul.msk.f32.vlgmr.msrb.gmra.mxu1 %vm1268_vm7, %v1232_v29  ;;  %v709_v63 = vmax.f32 %v507_v10, 0.0  ;;  %v855_v3 = vpop.permute.xlu2 %854  ;;  %v591_v10 = vadd.f32 %v2059_v47, %v590_v50 }
 0x176   :  { %v754_v33 = vmax.f32 %v642_v62, 0.0 }
 0x177   :  { %v805_v41 = vmax.f32 %v776_v42, %v709_v63  ;;  %v737_v63 = vmax.f32 %v591_v10, 0.0 }
 0x178   :  { %v2557_v34 = vmax.f32 %v791_v12, %v754_v33  ;;  %v731_v12 = vmax.f32 %v573_v57, 0.0  ;;  %v588_v57 = vadd.f32 %v2059_v47, %v2543_v51 }
 0x179   :  { %864 = vrot.lane.b32.xlu1 %v2493_v39, %s1819_s23  ;;  %1088 = vrot.lane.b32.xlu2 %v805_v41, %s1816_s21  ;;  %v1163_v21 = vsel %vm1153_vm3, %v805_v41, %v2395_v28 }
 0x17a   :  { %1102 = vrot.lane.b32.xlu0 %v2546_v31, %s1816_s21  ;;  %v1189_v30 = vsel %vm1179_vm2, %v1163_v21, %v2385_v19  ;;  %v1005_v19 = vpop.permute.xlu0 %1004  ;;  %v733_v21 = vmax.f32 %v579_v13, 0.0 }
 0x17b   :  { %v1215_v46 = vsel %vm1205_vm5, %v1189_v30, %v2381_v18  ;;  %v2565_v59 = vpop.f32.mrf.mxu3  ;;  %v1155_v18 = vsel %vm1153_vm3, %v2153_v37, %v853_v23  ;;  %v576_v37 = vadd.f32 %v2059_v47, %v2456_v44  ;;  %v1156_v44 = vsel %vm1153_vm3, %v2205_v5, %v855_v3 }
 0x17c   :  { %v2563_v40 = vsel %vm1231_vm6, %v1215_v46, %v2470_v56  ;;  %v1181_v56 = vsel %vm1179_vm2, %v1155_v18, %v929_v14  ;;  %v593_v0 = vpop.f32.mrf.mxu2  ;;  %v597_v23 = vadd.f32 %v2059_v47, %v2301_v7  ;;  %v582_v18 = vadd.f32 %v2059_v47, %v2496_v48 }
 0x17d   :  { %v1207_v1 = vsel %vm1205_vm5, %v1181_v56, %v1005_v19  ;;  %v594_v29 = vadd.f32 %v2059_v47, %v593_v0  ;;  %v732_v24 = vmax.f32 %v576_v37, 0.0  ;;  %v585_v56 = vadd.f32 %v2059_v47, %v2517_v16 }
 0x17e   :  { %v736_v37 = vmax.f32 %v588_v57, 0.0 }
 0x17f   :  { %v738_v2 = vmax.f32 %v594_v29, 0.0  ;;  %v784_v33 = vmax.f32 %v731_v12, %v732_v24 }
 0x181   :  { %1024 = vrot.lane.b32.xlu1 %v2287_v58, %s1817_s28  ;;  %1014 = vrot.lane.b32.xlu2 %v805_v41, %s1817_s28  ;;  %v786_v5 = vmax.f32 %v737_v63, %v738_v2  ;;  %v2608_v14 = vmax.f32 %v784_v33, %v733_v21  ;;  %v2683_v33 = vld [vmem:[%s3015_s2] ss:$0 sm:$0xff] }
 0x182   :  { %1028 = vrot.lane.b32.xlu0 %v2546_v31, %s1817_s28  ;;  %v931_v42 = vpop.permute.xlu0 %930  ;;  %v645_v21 = vadd.f32 %v2683_v33, %v2565_v59 }
 0x183   :  { %v2572_v28 = vpop.f32.mrf.mxu3  ;;  %v1182_v62 = vsel %vm1179_vm2, %v1156_v44, %v931_v42 }
 0x189   :  { %950 = vrot.lane.b32.xlu1 %v2287_v58, %s1818_s1  ;;  %940 = vrot.lane.b32.xlu2 %v805_v41, %s1818_s1 }
 0x18a   :  { %954 = vrot.lane.b32.xlu0 %v2546_v31, %s1818_s1  ;;  %v857_v47 = vpop.permute.xlu0 %856 }
 0x18b   :  { %v1081_v54 = vpop.permute.xlu1 %1080  ;;  %v2593_v22 = vpop.f32.mrf.mxu3  ;;  %v1157_v10 = vsel %vm1153_vm3, %v2257_v36, %v857_v47 }
 0x18c   :  { %v1233_v4 = vsel %vm1231_vm6, %v1207_v1, %v1081_v54  ;;  %v1083_v30 = vpop.permute.xlu2 %1082  ;;  %v734_v1 = vmax.f32 %v582_v18, 0.0  ;;  %v735_v54 = vmax.f32 %v585_v56, 0.0  ;;  %v651_v18 = vadd.f32 %v2683_v33, %v2593_v22 }
 0x18d   :  { %1731 = vmatmul.msk.f32.gmra.mxu1 %vm1268_vm7, %v1233_v4 }
 0x18e   :  { %v785_v48 = vmax.f32 %v734_v1, %v735_v54  ;;  %v757_v54 = vmax.f32 %v651_v18, 0.0 }
 0x190   :  { %v2642_v4 = vmax.f32 %v785_v48, %v736_v37 }
 0x191   :  { %876 = vrot.lane.b32.xlu1 %v2287_v58, %s1819_s23  ;;  %866 = vrot.lane.b32.xlu2 %v805_v41, %s1819_s23  ;;  %v739_v41 = vmax.f32 %v597_v23, 0.0 }
 0x192   :  { %880 = vrot.lane.b32.xlu0 %v2546_v31, %s1819_s23 }
 0x193   :  { %v1007_v8 = vpop.permute.xlu1 %1006  ;;  %v2610_v7 = vmax.f32 %v786_v5, %v739_v41  ;;  %v2618_v19 = vpop.f32.mrf.mxu3 }
 0x194   :  { %v1208_v46 = vsel %vm1205_vm5, %v1182_v62, %v1007_v8  ;;  %v1009_v3 = vpop.permute.xlu2 %1008 }
 0x195   :  { %v1234_v50 = vsel %vm1231_vm6, %v1208_v46, %v1083_v30  ;;  %v648_v30 = vadd.f32 %v2683_v33, %v2572_v28 }
 0x196   :  { %1732 = vmatmul.msk.f32.gmra.mxu1 %vm1268_vm7, %v1234_v50  ;;  %v755_v50 = vmax.f32 %v645_v21, 0.0 }
 0x197   :  { %v756_v41 = vmax.f32 %v648_v30, 0.0 }
 0x199   :  { %1104 = vrot.lane.b32.xlu1 %v2608_v14, %s1816_s21  ;;  %1026 = vrot.lane.b32.xlu2 %v2461_v52, %s1817_s28  ;;  %v792_v1 = vmax.f32 %v755_v50, %v756_v41  ;;  %v654_v50 = vadd.f32 %v2683_v33, %v2618_v19 }
 0x19a   :  { %1108 = vrot.lane.b32.xlu0 %v2610_v7, %s1816_s21 }
 0x19b   :  { %v2630_v0 = vpop.f32.mrf.mxu3  ;;  %v933_v51 = vpop.permute.xlu1 %932  ;;  %v821_v37 = vmax.f32 %v792_v1, %v757_v54 }
 0x19c   :  { %v935_v29 = vpop.permute.xlu2 %934  ;;  %v1183_v12 = vsel %vm1179_vm2, %v1157_v10, %v933_v51 }
 0x19d   :  { %v1209_v42 = vsel %vm1205_vm5, %v1183_v12, %v1009_v3 }
 0x1a1   :  { %1030 = vrot.lane.b32.xlu1 %v2608_v14, %s1817_s28  ;;  %952 = vrot.lane.b32.xlu2 %v2461_v52, %s1818_s1 }
 0x1a2   :  { %1034 = vrot.lane.b32.xlu0 %v2610_v7, %s1817_s28 }
 0x1a3   :  { %v2640_v16 = vpop.f32.mrf.mxu3  ;;  %v859_v23 = vpop.permute.xlu1 %858 }
 0x1a4   :  { %v861_v36 = vpop.permute.xlu2 %860  ;;  %v1158_v5 = vsel %vm1153_vm3, %v2299_v6, %v859_v23 }
 0x1a5   :  { %v1184_v59 = vsel %vm1179_vm2, %v1158_v5, %v935_v29  ;;  %v1159_v3 = vsel %vm1153_vm3, %v2332_v32, %v861_v36 }
 0x1a9   :  { %956 = vrot.lane.b32.xlu1 %v2608_v14, %s1818_s1  ;;  %878 = vrot.lane.b32.xlu2 %v2461_v52, %s1819_s23 }
 0x1aa   :  { %960 = vrot.lane.b32.xlu0 %v2610_v7, %s1818_s1 }
 0x1ab   :  { %v2653_v24 = vpop.f32.mrf.mxu3 }
 0x1ac   :  { %v2678_v62 = vpop.permute.xlu2 %1100 }
 0x1b1   :  { %882 = vrot.lane.b32.xlu1 %v2608_v14, %s1819_s23  ;;  %1106 = vrot.lane.b32.xlu2 %v2642_v4, %s1816_s21 }
 0x1b2   :  { %886 = vrot.lane.b32.xlu0 %v2610_v7, %s1819_s23 }
 0x1b3   :  { %v2670_v2 = vpop.f32.mrf.mxu3 }
 0x1b9   :  { %1110 = vrot.lane.b32.xlu1 %v2344_v43, %s1816_s21  ;;  %1032 = vrot.lane.b32.xlu2 %v2642_v4, %s1817_s28 }
 0x1ba   :  { %1114 = vrot.lane.b32.xlu0 %v2450_v38, %s1816_s21 }
 0x1bb   :  { %v1085_v13 = vpop.permute.xlu0 %1084  ;;  %v2689_v46 = vpop.f32.mrf.mxu3 }
 0x1bc   :  { %v1235_v63 = vsel %vm1231_vm6, %v1209_v42, %v1085_v13 }
 0x1bd   :  { %1733 = vmatmul.msk.f32.gmra.mxu1 %vm1268_vm7, %v1235_v63 }
 0x1c1   :  { %1036 = vrot.lane.b32.xlu1 %v2344_v43, %s1817_s28  ;;  %958 = vrot.lane.b32.xlu2 %v2642_v4, %s1818_s1 }
 0x1c2   :  { %1040 = vrot.lane.b32.xlu0 %v2450_v38, %s1817_s28 }
 0x1c3   :  { %v1011_v44 = vpop.permute.xlu0 %1010  ;;  %v671_v48 = vpop.f32.mrf.mxu3 }
 0x1c4   :  { %v1210_v28 = vsel %vm1205_vm5, %v1184_v59, %v1011_v44  ;;  %v672_v30 = vadd.f32 %v2683_v33, %v671_v48  ;;  %v660_v48 = vadd.f32 %v2683_v33, %v2640_v16 }
 0x1c6   :  { %v760_v16 = vmax.f32 %v660_v48, 0.0 }
 0x1c9   :  { %962 = vrot.lane.b32.xlu1 %v2344_v43, %s1818_s1  ;;  %884 = vrot.lane.b32.xlu2 %v2642_v4, %s1819_s23 }
 0x1ca   :  { %966 = vrot.lane.b32.xlu0 %v2450_v38, %s1818_s1 }
 0x1cb   :  { %v937_v8 = vpop.permute.xlu0 %936  ;;  %v674_v42 = vpop.f32.mrf.mxu3 }
 0x1cc   :  { %v1185_v47 = vsel %vm1179_vm2, %v1159_v3, %v937_v8 }
 0x1d1   :  { %888 = vrot.lane.b32.xlu1 %v2344_v43, %s1819_s23  ;;  %1112 = vrot.lane.b32.xlu2 %v2392_v26, %s1816_s21 }
 0x1d2   :  { %892 = vrot.lane.b32.xlu0 %v2450_v38, %s1819_s23 }
 0x1d3   :  { %v1087_v56 = vpop.permute.xlu1 %1086  ;;  %v1089_v6 = vpop.permute.xlu2 %1088 }
 0x1d4   :  { %v863_v57 = vpop.permute.xlu0 %862  ;;  %v1236_v22 = vsel %vm1231_vm6, %v1210_v28, %v1087_v56  ;;  %v677_v5 = vpop.f32.mrf.mxu3  ;;  %v764_v56 = vmax.f32 %v672_v30, 0.0 }
 0x1d5   :  { %1734 = vmatmul.msk.f32.gmra.mxu1 %vm1268_vm7, %v1236_v22  ;;  %v1160_v32 = vsel %vm1153_vm3, %v2378_v15, %v863_v57  ;;  %v675_v15 = vadd.f32 %v2683_v33, %v674_v42  ;;  %v678_v57 = vadd.f32 %v2683_v33, %v677_v5 }
 0x1d7   :  { %v765_v54 = vmax.f32 %v675_v15, 0.0 }
 0x1d9   :  { %1116 = vrot.lane.b32.xlu1 %v2504_v60, %s1816_s21  ;;  %1038 = vrot.lane.b32.xlu2 %v2392_v26, %s1817_s28 }
 0x1da   :  { %1120 = vrot.lane.b32.xlu0 %v821_v37, %s1816_s21 }
 0x1db   :  { %v1013_v51 = vpop.permute.xlu1 %1012  ;;  %v1015_v10 = vpop.permute.xlu2 %1014 }
 0x1dc   :  { %v1211_v29 = vsel %vm1205_vm5, %v1185_v47, %v1013_v51  ;;  %v2714_v12 = vpop.permute.xlu0 %948 }
 0x1dd   :  { %v1237_v13 = vsel %vm1231_vm6, %v1211_v29, %v1089_v6 }
 0x1de   :  { %1735 = vmatmul.msk.f32.gmra.mxu1 %vm1268_vm7, %v1237_v13 }
 0x1e1   :  { %1042 = vrot.lane.b32.xlu1 %v2504_v60, %s1817_s28  ;;  %964 = vrot.lane.b32.xlu2 %v2392_v26, %s1818_s1 }
 0x1e2   :  { %1046 = vrot.lane.b32.xlu0 %v821_v37, %s1817_s28 }
 0x1e3   :  { %v939_v63 = vpop.permute.xlu1 %938  ;;  %v941_v36 = vpop.permute.xlu2 %940 }
 0x1e4   :  { %v1186_v44 = vsel %vm1179_vm2, %v1160_v32, %v939_v63  ;;  %v2726_v23 = vpop.permute.xlu0 %874 }
 0x1e5   :  { %v1212_v8 = vsel %vm1205_vm5, %v1186_v44, %v1015_v10 }
 0x1e6   :  { %v1238_v21 = vsel %vm1231_vm6, %v1212_v8, %v2337_v35  ;;  %v657_v35 = vadd.f32 %v2683_v33, %v2630_v0  ;;  %v758_v0 = vmax.f32 %v654_v50, 0.0 }
 0x1e7   :  { %1736 = vmatmul.msk.f32.gmra.mxu1 %vm1268_vm7, %v1238_v21 }
 0x1e8   :  { %v759_v22 = vmax.f32 %v657_v35, 0.0 }
 0x1e9   :  { %968 = vrot.lane.b32.xlu1 %v2504_v60, %s1818_s1  ;;  %890 = vrot.lane.b32.xlu2 %v2392_v26, %s1819_s23 }
 0x1ea   :  { %972 = vrot.lane.b32.xlu0 %v821_v37, %s1818_s1  ;;  %v793_v47 = vmax.f32 %v758_v0, %v759_v22 }
 0x1eb   :  { %v865_v41 = vpop.permute.xlu1 %864  ;;  %v867_v18 = vpop.permute.xlu2 %866 }
 0x1ec   :  { %v1161_v59 = vsel %vm1153_vm3, %v2431_v17, %v865_v41  ;;  %v2745_v28 = vpop.permute.xlu0 %1102  ;;  %v1162_v1 = vsel %vm1153_vm3, %v2493_v39, %v867_v18  ;;  %v766_v39 = vmax.f32 %v678_v57, 0.0  ;;  %v822_v13 = vmax.f32 %v793_v47, %v760_v16 }
 0x1ed   :  { %v1187_v6 = vsel %vm1179_vm2, %v1161_v59, %v941_v36  ;;  %v1188_v3 = vsel %vm1179_vm2, %v1162_v1, %v2374_v9  ;;  %v666_v36 = vadd.f32 %v2683_v33, %v2670_v2  ;;  %v1165_v2 = vsel %vm1153_vm3, %v2127_v20, %v2524_v27 }
 0x1ee   :  { %v1213_v19 = vsel %vm1205_vm5, %v1187_v6, %v2354_v49  ;;  %v795_v49 = vmax.f32 %v764_v56, %v765_v54  ;;  %v1214_v29 = vsel %vm1205_vm5, %v1188_v3, %v2367_v61  ;;  %v1191_v50 = vsel %vm1179_vm2, %v1165_v2, %v2714_v12 }
 0x1ef   :  { %v1239_v17 = vsel %vm1231_vm6, %v1213_v19, %v2349_v45  ;;  %v1240_v42 = vsel %vm1231_vm6, %v1214_v29, %v2360_v53  ;;  %v663_v53 = vadd.f32 %v2683_v33, %v2653_v24  ;;  %v762_v15 = vmax.f32 %v666_v36, 0.0 }
 0x1f0   :  { %1737 = vmatmul.msk.f32.gmra.mxu1 %vm1268_vm7, %v1239_v17  ;;  %v824_v9 = vmax.f32 %v795_v49, %v766_v39  ;;  %v1166_v12 = vsel %vm1153_vm3, %v2184_v55, %v2726_v23 }
 0x1f1   :  { %894 = vrot.lane.b32.xlu1 %v2504_v60, %s1819_s23  ;;  %1118 = vrot.lane.b32.xlu2 %v2557_v34, %s1816_s21  ;;  %v761_v30 = vmax.f32 %v663_v53, 0.0 }
 0x1f2   :  { %898 = vrot.lane.b32.xlu0 %v821_v37, %s1819_s23  ;;  %v1365_v61 = vpop.f32.mrf.mxu1 }
 0x1f3   :  { %v1025_v51 = vpop.permute.xlu1 %1024  ;;  %v1027_v10 = vpop.permute.xlu2 %1026  ;;  %v794_v5 = vmax.f32 %v761_v30, %v762_v15 }
 0x1f4   :  { %v2765_v45 = vpop.permute.xlu0 %1028  ;;  %v1217_v41 = vsel %vm1205_vm5, %v1191_v50, %v1025_v51 }
 0x1f5   :  { %v1243_v27 = vsel %vm1231_vm6, %v1217_v41, %v2678_v62 }
 0x1f8   :  { %1738 = vmatmul.msk.f32.gmra.mxu1 %vm1268_vm7, %v1240_v42 }
 0x1f9   :  { %1122 = vrot.lane.b32.xlu1 %v822_v13, %s1816_s21  ;;  %1044 = vrot.lane.b32.xlu2 %v2557_v34, %s1817_s28 }
 0x1fa   :  { %1126 = vrot.lane.b32.xlu0 %v824_v9, %s1816_s21 }
 0x1fb   :  { %v951_v37 = vpop.permute.xlu1 %950  ;;  %v953_v32 = vpop.permute.xlu2 %952 }
 0x1fc   :  { %v955_v63 = vpop.permute.xlu0 %954  ;;  %v1192_v6 = vsel %vm1179_vm2, %v1166_v12, %v951_v37 }
 0x1fd   :  { %v1218_v62 = vsel %vm1205_vm5, %v1192_v6, %v1027_v10 }
 0x1fe   :  { %v1244_v55 = vsel %vm1231_vm6, %v1218_v62, %v2745_v28 }
 0x200   :  { %1739 = vmatmul.msk.f32.gmra.mxu1 %vm1268_vm7, %v2563_v40  ;;  %v669_v40 = vadd.f32 %v2683_v33, %v2689_v46  ;;  %v2800_v33 = vld [vmem:[%s3017_s4] ss:$0 sm:$0xff] }
 0x201   :  { %1048 = vrot.lane.b32.xlu1 %v822_v13, %s1817_s28  ;;  %970 = vrot.lane.b32.xlu2 %v2557_v34, %s1818_s1  ;;  %v1366_v20 = vadd.f32 %v2800_v33, %v1365_v61 }
 0x202   :  { %v763_v35 = vmax.f32 %v669_v40, 0.0 }
 0x203   :  { %v877_v44 = vpop.permute.xlu1 %876  ;;  %v879_v8 = vpop.permute.xlu2 %878  ;;  %v1440_v19 = vmax.f32 %v1366_v20, 0.0 }
 0x204   :  { %v881_v21 = vpop.permute.xlu0 %880  ;;  %v823_v56 = vmax.f32 %v794_v5, %v763_v35  ;;  %v1167_v23 = vsel %vm1153_vm3, %v2240_v25, %v877_v44  ;;  %v1168_v28 = vsel %vm1153_vm3, %v2287_v58, %v879_v8 }
 0x205   :  { %v1193_v39 = vsel %vm1179_vm2, %v1167_v23, %v953_v32  ;;  %v1194_v25 = vsel %vm1179_vm2, %v1168_v28, %v955_v63  ;;  %v1169_v61 = vsel %vm1153_vm3, %v2461_v52, %v881_v21 }
 0x206   :  { %v1219_v10 = vsel %vm1205_vm5, %v1193_v39, %v2765_v45 }
 0x208   :  { %1740 = vmatmul.msk.f32.gmra.mxu1 %vm1268_vm7, %v2515_v11 }
 0x209   :  { %974 = vrot.lane.b32.xlu1 %v822_v13, %s1818_s1  ;;  %896 = vrot.lane.b32.xlu2 %v2557_v34, %s1819_s23 }
 0x20a   :  { %v1368_v24 = vpop.f32.mrf.mxu1 }
 0x20b   :  { %v1105_v11 = vpop.permute.xlu1 %1104  ;;  %v1107_v46 = vpop.permute.xlu2 %1106  ;;  %v1369_v59 = vadd.f32 %v2800_v33, %v1368_v24 }
 0x20c   :  { %v1109_v18 = vpop.permute.xlu0 %1108  ;;  %v1245_v29 = vsel %vm1231_vm6, %v1219_v10, %v1105_v11 }
 0x20d   :  { %v1441_v1 = vmax.f32 %v1369_v59, 0.0 }
 0x20f   :  { %v1465_v17 = vmax.f32 %v1440_v19, %v1441_v1 }
 0x210   :  { %1741 = vmatmul.msk.f32.gmra.mxu1 %vm1268_vm7, %v1243_v27 }
 0x211   :  { %1124 = vrot.lane.b32.xlu2 %v823_v56, %s1816_s21 }
 0x213   :  { %v1371_v54 = vpop.f32.mrf.mxu1  ;;  %v1031_v57 = vpop.permute.xlu1 %1030 }
 0x214   :  { %v1033_v0 = vpop.permute.xlu2 %1032  ;;  %v1372_v22 = vadd.f32 %v2800_v33, %v1371_v54  ;;  %v1035_v48 = vpop.permute.xlu0 %1034  ;;  %v1220_v42 = vsel %vm1205_vm5, %v1194_v25, %v1031_v57 }
 0x215   :  { %v1246_v32 = vsel %vm1231_vm6, %v1220_v42, %v1107_v46 }
 0x216   :  { %v1442_v3 = vmax.f32 %v1372_v22, 0.0 }
 0x218   :  { %v1470_v49 = vmax.f32 %v1465_v17, %v1442_v3  ;;  %1742 = vmatmul.msk.f32.gmra.mxu1 %vm1268_vm7, %v1244_v55 }
 0x219   :  { %1050 = vrot.lane.b32.xlu2 %v823_v56, %s1817_s28 }
 0x21b   :  { %v957_v47 = vpop.permute.xlu1 %956 }
 0x21c   :  { %v959_v16 = vpop.permute.xlu2 %958  ;;  %v961_v51 = vpop.permute.xlu0 %960  ;;  %v1195_v45 = vsel %vm1179_vm2, %v1169_v61, %v957_v47 }
 0x21d   :  { %v1221_v36 = vsel %vm1205_vm5, %v1195_v45, %v1033_v0 }
 0x21e   :  { %v1247_v63 = vsel %vm1231_vm6, %v1221_v36, %v1109_v18 }
 0x220   :  { %1743 = vmatmul.msk.f32.gmra.mxu1 %vm1268_vm7, %v1245_v29 }
 0x223   :  { %v883_v9 = vpop.permute.xlu1 %882 }
 0x224   :  { %v885_v13 = vpop.permute.xlu2 %884  ;;  %v887_v37 = vpop.permute.xlu0 %886  ;;  %v1170_v8 = vsel %vm1153_vm3, %v2546_v31, %v883_v9 }
 0x225   :  { %v1196_v30 = vsel %vm1179_vm2, %v1170_v8, %v959_v16  ;;  %v1171_v24 = vsel %vm1153_vm3, %v2608_v14, %v885_v13  ;;  %v1172_v56 = vsel %vm1153_vm3, %v2642_v4, %v887_v37 }
 0x226   :  { %v1222_v21 = vsel %vm1205_vm5, %v1196_v30, %v1035_v48  ;;  %v1197_v50 = vsel %vm1179_vm2, %v1171_v24, %v961_v51 }
 0x228   :  { %1744 = vmatmul.msk.f32.gmra.mxu1 %vm1268_vm7, %v1246_v32 }
 0x22b   :  { %v1111_v53 = vpop.permute.xlu1 %1110 }
 0x22c   :  { %v1113_v58 = vpop.permute.xlu2 %1112  ;;  %v1115_v44 = vpop.permute.xlu0 %1114  ;;  %v1248_v40 = vsel %vm1231_vm6, %v1222_v21, %v1111_v53 }
 0x230   :  { %1745 = vmatmul.msk.f32.gmra.mxu1 %vm1268_vm7, %v1247_v63 }
 0x233   :  { %v1037_v15 = vpop.permute.xlu1 %1036 }
 0x234   :  { %v1039_v52 = vpop.permute.xlu2 %1038  ;;  %v1041_v2 = vpop.permute.xlu0 %1040  ;;  %v1223_v46 = vsel %vm1205_vm5, %v1197_v50, %v1037_v15 }
 0x235   :  { %v1249_v59 = vsel %vm1231_vm6, %v1223_v46, %v1113_v58 }
 0x238   :  { %1746 = vmatmul.msk.f32.gmra.mxu1 %vm1268_vm7, %v1248_v40 }
 0x23a   :  { %v1374_v5 = vpop.f32.mrf.mxu1 }
 0x23b   :  { %v1375_v31 = vadd.f32 %v2800_v33, %v1374_v5  ;;  %v963_v35 = vpop.permute.xlu1 %962 }
 0x23c   :  { %v965_v11 = vpop.permute.xlu2 %964  ;;  %v1198_v14 = vsel %vm1179_vm2, %v1172_v56, %v963_v35  ;;  %v967_v20 = vpop.permute.xlu0 %966 }
 0x23d   :  { %v1443_v41 = vmax.f32 %v1375_v31, 0.0  ;;  %v1224_v6 = vsel %vm1205_vm5, %v1198_v14, %v1039_v52 }
 0x23e   :  { %v1250_v1 = vsel %vm1231_vm6, %v1224_v6, %v1115_v44 }
 0x23f   :  { %v1475_v18 = vmax.f32 %v1470_v49, %v1443_v41 }
 0x240   :  { %1747 = vmatmul.msk.f32.gmra.mxu1 %vm1268_vm7, %v1249_v59 }
 0x243   :  { %v889_v27 = vpop.permute.xlu1 %888 }
 0x244   :  { %v891_v12 = vpop.permute.xlu2 %890  ;;  %v1173_v54 = vsel %vm1153_vm3, %v2610_v7, %v889_v27  ;;  %v893_v0 = vpop.permute.xlu0 %892 }
 0x245   :  { %v1199_v19 = vsel %vm1179_vm2, %v1173_v54, %v965_v11  ;;  %v1174_v62 = vsel %vm1153_vm3, %v2344_v43, %v891_v12  ;;  %v1175_v43 = vsel %vm1153_vm3, %v2392_v26, %v893_v0 }
 0x246   :  { %v1225_v22 = vsel %vm1205_vm5, %v1199_v19, %v1041_v2  ;;  %v1200_v49 = vsel %vm1179_vm2, %v1174_v62, %v967_v20 }
 0x248   :  { %1748 = vmatmul.msk.f32.gmra.mxu1 %vm1268_vm7, %v1250_v1 }
 0x24b   :  { %v1117_v57 = vpop.permute.xlu1 %1116 }
 0x24c   :  { %v1119_v4 = vpop.permute.xlu2 %1118  ;;  %v1251_v48 = vsel %vm1231_vm6, %v1225_v22, %v1117_v57  ;;  %v1121_v47 = vpop.permute.xlu0 %1120 }
 0x250   :  { %1749 = vmatmul.msk.f32.gmra.mxu1 %vm1268_vm7, %v1251_v48 }
 0x252   :  { %v1377_v17 = vpop.f32.mrf.mxu1 }
 0x253   :  { %v1378_v3 = vadd.f32 %v2800_v33, %v1377_v17  ;;  %v1043_v7 = vpop.permute.xlu1 %1042 }
 0x254   :  { %v1226_v55 = vsel %vm1205_vm5, %v1200_v49, %v1043_v7  ;;  %v1045_v23 = vpop.permute.xlu2 %1044  ;;  %v1047_v42 = vpop.permute.xlu0 %1046 }
 0x255   :  { %v1444_v39 = vmax.f32 %v1378_v3, 0.0  ;;  %v1252_v51 = vsel %vm1231_vm6, %v1226_v55, %v1119_v4  ;;  %v1511_v4 = vld [vmem:[%s3018_s5 + $0x30] sm:$0x3] }
 0x256   :  { %1755 = vmatpush.msk.msrb.mxu2 %vm1344_vm4, %v1511_v4 }
 0x257   :  { %v2868_v16 = vmax.f32 %v1475_v18, %v1444_v39 }
 0x258   :  { %1750 = vmatmul.msk.f32.gmra.mxu1 %vm1268_vm7, %v1252_v51 }
 0x25b   :  { %v969_v10 = vpop.permute.xlu1 %968  ;;  %v1380_v28 = vpop.f32.mrf.mxu1 }
 0x25c   :  { %v1201_v29 = vsel %vm1179_vm2, %v1175_v43, %v969_v10  ;;  %v971_v9 = vpop.permute.xlu2 %970  ;;  %v973_v53 = vpop.permute.xlu0 %972  ;;  %v1381_v5 = vadd.f32 %v2800_v33, %v1380_v28 }
 0x25d   :  { %v1227_v25 = vsel %vm1205_vm5, %v1201_v29, %v1045_v23 }
 0x25e   :  { %v1253_v13 = vsel %vm1231_vm6, %v1227_v25, %v1121_v47  ;;  %v1445_v35 = vmax.f32 %v1381_v5, 0.0  ;;  %v1510_v47 = vld [vmem:[%s3018_s5 + $0x28] sm:$0xff] }
 0x25f   :  { %1532 = vmatpush.msrb.mxu2 %v1510_v47  ;;  %v1544_v47 = vld [vmem:[%s3020_s7 + $0x8] sm:$0xff] }
 0x260   :  { %1751 = vmatmul.msk.f32.gmra.mxu1 %vm1268_vm7, %v1253_v13 }
 0x263   :  { %v895_v37 = vpop.permute.xlu1 %894 }
 0x264   :  { %v1383_v32 = vpop.f32.mrf.mxu1  ;;  %v1176_v61 = vsel %vm1153_vm3, %v2450_v38, %v895_v37  ;;  %v897_v26 = vpop.permute.xlu2 %896 }
 0x265   :  { %v1202_v45 = vsel %vm1179_vm2, %v1176_v61, %v971_v9  ;;  %v1177_v8 = vsel %vm1153_vm3, %v2504_v60, %v897_v26  ;;  %v1384_v38 = vadd.f32 %v2800_v33, %v1383_v32  ;;  %v899_v40 = vpop.permute.xlu0 %898  ;;  %v1509_v61 = vld [vmem:[%s3018_s5 + $0x20] sm:$0xff] }
 0x266   :  { %v1228_v36 = vsel %vm1205_vm5, %v1202_v45, %v1047_v42  ;;  %v1203_v52 = vsel %vm1179_vm2, %v1177_v8, %v973_v53  ;;  %v1178_v46 = vsel %vm1153_vm3, %v2557_v34, %v899_v40  ;;  %1533 = vmatpush.msrb.mxu2 %v1509_v61 }
 0x267   :  { %v1446_v31 = vmax.f32 %v1384_v38, 0.0 }
 0x269   :  { %v1466_v18 = vmax.f32 %v1445_v35, %v1446_v31  ;;  %v1555_v35 = vld [vmem:[%s3020_s7 + $0x60] sm:$0xf] }
 0x26a   :  { %1757 = vmatpush.msk.msrb.mxu3 %vm1564_vm8, %v1555_v35 }
 0x26b   :  { %v1123_v58 = vpop.permute.xlu1 %1122 }
 0x26c   :  { %v1254_v44 = vsel %vm1231_vm6, %v1228_v36, %v1123_v58  ;;  %v1125_v30 = vpop.permute.xlu2 %1124 }
 0x26d   :  { %v1386_v63 = vpop.f32.mrf.mxu1  ;;  %1752 = vmatmul.msk.f32.gmra.mxu1 %vm1268_vm7, %v1254_v44  ;;  %v1127_v20 = vpop.permute.xlu0 %1126 }
 0x26e   :  { %v1387_v50 = vadd.f32 %v2800_v33, %v1386_v63 }
 0x270   :  { %v1447_v11 = vmax.f32 %v1387_v50, 0.0  ;;  %v1508_v50 = vld [vmem:[%s3018_s5 + $0x18] sm:$0xff] }
 0x271   :  { %1534 = vmatpush.msrb.mxu2 %v1508_v50 }
 0x272   :  { %v1471_v6 = vmax.f32 %v1466_v18, %v1447_v11  ;;  %v1554_v11 = vld [vmem:[%s3020_s7 + $0x58] sm:$0xff] }
 0x273   :  { %v1049_v15 = vpop.permute.xlu1 %1048  ;;  %1572 = vmatpush.msrb.mxu3 %v1554_v11 }
 0x274   :  { %v1229_v21 = vsel %vm1205_vm5, %v1203_v52, %v1049_v15  ;;  %v1051_v59 = vpop.permute.xlu2 %1050 }
 0x275   :  { %v1389_v24 = vpop.f32.mrf.mxu1  ;;  %v1255_v2 = vsel %vm1231_vm6, %v1229_v21, %v1125_v30 }
 0x276   :  { %1753 = vmatmul.msk.f32.gmra.mxu1 %vm1268_vm7, %v1255_v2  ;;  %v1390_v60 = vadd.f32 %v2800_v33, %v1389_v24 }
 0x278   :  { %v1448_v56 = vmax.f32 %v1390_v60, 0.0  ;;  %v1507_v60 = vld [vmem:[%s3018_s5 + $0x10] sm:$0xff] }
 0x279   :  { %1535 = vmatpush.msrb.mxu2 %v1507_v60 }
 0x27a   :  { %v1476_v19 = vmax.f32 %v1471_v6, %v1448_v56 }
 0x27b   :  { %v975_v41 = vpop.permute.xlu1 %974 }
 0x27c   :  { %v1204_v14 = vsel %vm1179_vm2, %v1178_v46, %v975_v41  ;;  %v1506_v46 = vld [vmem:[%s3018_s5 + $0x8] sm:$0xff]  ;;  %v1553_v41 = vld [vmem:[%s3020_s7 + $0x50] sm:$0xff] }
 0x27d   :  { %v1230_v27 = vsel %vm1205_vm5, %v1204_v14, %v1051_v59  ;;  %v1392_v12 = vpop.f32.mrf.mxu1  ;;  %1536 = vmatpush.msrb.mxu2 %v1506_v46  ;;  %1573 = vmatpush.msrb.mxu3 %v1553_v41 }
 0x27e   :  { %v1393_v1 = vadd.f32 %v2800_v33, %v1392_v12  ;;  %v1256_v54 = vsel %vm1231_vm6, %v1230_v27, %v1127_v20 }
 0x27f   :  { %1754 = vmatmul.msk.f32.gmra.mxu1 %vm1268_vm7, %v1256_v54 }
 0x280   :  { %v1449_v57 = vmax.f32 %v1393_v1, 0.0 }
 0x282   :  { %v1481_v34 = vmax.f32 %v1476_v19, %v1449_v57 }
 0x284   :  { %1486 = vrot.lane.b32.xlu1 %v1481_v34, %s1819_s23  ;;  %s1630_s23 = sshll.u32 %s1820_s27, 4  ;;  %s1631_s23 = int_to_ptr.vmem [resolvable:$true] %s1630_s23 }
 0x285   :  { %v1395_v0 = vpop.f32.mrf.mxu1 }
 0x286   :  { %v1396_v3 = vadd.f32 %v2800_v33, %v1395_v0 }
 0x288   :  { %v1450_v23 = vmax.f32 %v1396_v3, 0.0  ;;  %v1551_v3 = vld [vmem:[%s3020_s7 + $0x40] sm:$0xff] }
 0x28d   :  { %v1398_v22 = vpop.f32.mrf.mxu1 }
 0x28e   :  { %v1399_v62 = vadd.f32 %v2800_v33, %v1398_v22 }
 0x290   :  { %v1451_v49 = vmax.f32 %v1399_v62, 0.0  ;;  %v1552_v62 = vld [vmem:[%s3020_s7 + $0x48] sm:$0xff] }
 0x291   :  { %1574 = vmatpush.msrb.mxu3 %v1552_v62 }
 0x292   :  { %v1467_v51 = vmax.f32 %v1450_v23, %v1451_v49  ;;  %v1548_v49 = vld [vmem:[%s3020_s7 + $0x28] sm:$0xff]  ;;  %v1546_v23 = vld [vmem:[%s3020_s7 + $0x18] sm:$0xff] }
 0x293   :  { %1575 = vmatpush.msrb.mxu3 %v1551_v3 }
 0x295   :  { %v1401_v48 = vpop.f32.mrf.mxu1 }
 0x296   :  { %v1402_v7 = vadd.f32 %v2800_v33, %v1401_v48 }
 0x298   :  { %v1452_v39 = vmax.f32 %v1402_v7, 0.0  ;;  %v1549_v7 = vld [vmem:[%s3020_s7 + $0x30] sm:$0xff] }
 0x29a   :  { %v1472_v29 = vmax.f32 %v1467_v51, %v1452_v39  ;;  %v1545_v39 = vld [vmem:[%s3020_s7 + $0x10] sm:$0xff]  ;;  %v1543_v51 = vld [vmem:[%s3020_s7] sm:$0xff] }
 0x29d   :  { %v1404_v17 = vpop.f32.mrf.mxu1 }
 0x29e   :  { %v1405_v55 = vadd.f32 %v2800_v33, %v1404_v17  ;;  %v1505_v17 = vld [vmem:[%s3018_s5] sm:$0xff] }
 0x29f   :  { %1537 = vmatpush.msrb.mxu2 %v1505_v17 }
 0x2a0   :  { %v1453_v43 = vmax.f32 %v1405_v55, 0.0  ;;  %v1547_v55 = vld [vmem:[%s3020_s7 + $0x20] sm:$0xff] }
 0x2a2   :  { %v1477_v25 = vmax.f32 %v1472_v29, %v1453_v43 }
 0x2a5   :  { %v1407_v10 = vpop.f32.mrf.mxu1 }
 0x2a6   :  { %v1408_v28 = vadd.f32 %v2800_v33, %v1407_v10 }
 0x2a8   :  { %v1454_v9 = vmax.f32 %v1408_v28, 0.0 }
 0x2aa   :  { %v1482_v13 = vmax.f32 %v1477_v25, %v1454_v9 }
 0x2ac   :  { %1490 = vrot.lane.b32.xlu2 %v1482_v13, %s1818_s1 }
 0x2ad   :  { %v1410_v42 = vpop.f32.mrf.mxu1 }
 0x2ae   :  { %v1411_v53 = vadd.f32 %v2800_v33, %v1410_v42 }
 0x2b0   :  { %v1455_v63 = vmax.f32 %v1411_v53, 0.0  ;;  %v1590_v53 = vld [vmem:[%s3022_s9 + $0x8] sm:$0xff] }
 0x2b5   :  { %v1413_v37 = vpop.f32.mrf.mxu1 }
 0x2b6   :  { %v1414_v45 = vadd.f32 %v2800_v33, %v1413_v37  ;;  %v1592_v37 = vld [vmem:[%s3022_s9 + $0x18] sm:$0x3f] }
 0x2b7   :  { %1759 = vmatpush.msk.msra.mxu2 %vm1600_vm9, %v1592_v37 }
 0x2b8   :  { %v1456_v36 = vmax.f32 %v1414_v45, 0.0 }
 0x2ba   :  { %v1468_v30 = vmax.f32 %v1455_v63, %v1456_v36  ;;  %v1787_v36 = vld [vmem:[%s3021_s8] ss:$0 sm:$0xff] }
 0x2bd   :  { %v1416_v32 = vpop.f32.mrf.mxu1 }
 0x2be   :  { %v1417_v58 = vadd.f32 %v2800_v33, %v1416_v32  ;;  %v1591_v32 = vld [vmem:[%s3022_s9 + $0x10] sm:$0xff] }
 0x2bf   :  { %1617 = vmatpush.msra.mxu2 %v1591_v32 }
 0x2c0   :  { %v1457_v8 = vmax.f32 %v1417_v58, 0.0  ;;  %v1589_v58 = vld [vmem:[%s3022_s9] sm:$0xff]  ;;  %s1632_s9 = sshll.u32 %s3024_s11, 4  ;;  %s1633_s9 = int_to_ptr.hbm [resolvable:$true] %s1632_s9 }
 0x2c1   :  { %1618 = vmatpush.msra.mxu2 %v1590_v53 }
 0x2c2   :  { %v1473_v38 = vmax.f32 %v1468_v30, %v1457_v8  ;;  %v1788_v30 = vld [vmem:[%s3023_s10] ss:$0 sm:$0xff] }
 0x2c3   :  { %1619 = vmatpush.msra.mxu2 %v1589_v58 }
 0x2c5   :  { %v1419_v26 = vpop.f32.mrf.mxu1 }
 0x2c6   :  { %v1420_v44 = vadd.f32 %v2800_v33, %v1419_v26 }
 0x2c8   :  { %v1458_v15 = vmax.f32 %v1420_v44, 0.0 }
 0x2ca   :  { %v1478_v40 = vmax.f32 %v1473_v38, %v1458_v15 }
 0x2cd   :  { %v1422_v52 = vpop.f32.mrf.mxu1 }
 0x2ce   :  { %v1423_v21 = vadd.f32 %v2800_v33, %v1422_v52 }
 0x2d0   :  { %v1459_v24 = vmax.f32 %v1423_v21, 0.0 }
 0x2d2   :  { %v1483_v2 = vmax.f32 %v1478_v40, %v1459_v24 }
 0x2d4   :  { %1494 = vrot.lane.b32.xlu0 %v1483_v2, %s1817_s28 }
 0x2d5   :  { %v1425_v5 = vpop.f32.mrf.mxu1 }
 0x2d6   :  { %v1426_v14 = vadd.f32 %v2800_v33, %v1425_v5 }
 0x2d8   :  { %v1460_v6 = vmax.f32 %v1426_v14, 0.0 }
 0x2dd   :  { %v1428_v31 = vpop.f32.mrf.mxu1 }
 0x2de   :  { %v1429_v59 = vadd.f32 %v2800_v33, %v1428_v31 }
 0x2e0   :  { %v1461_v27 = vmax.f32 %v1429_v59, 0.0 }
 0x2e2   :  { %v1469_v54 = vmax.f32 %v1460_v6, %v1461_v27 }
 0x2ea   :  { %v1431_v18 = vpop.f32.mrf.mxu1 }
 0x2eb   :  { %v1432_v20 = vadd.f32 %v2800_v33, %v1431_v18 }
 0x2ed   :  { %v1462_v1 = vmax.f32 %v1432_v20, 0.0 }
 0x2ef   :  { %v1474_v34 = vmax.f32 %v1469_v54, %v1462_v1 }
 0x2f3   :  { %v1434_v56 = vpop.f32.mrf.mxu1 }
 0x2f4   :  { %v1435_v12 = vadd.f32 %v2800_v33, %v1434_v56 }
 0x2f6   :  { %v1463_v19 = vmax.f32 %v1435_v12, 0.0  ;;  %v1487_v43 = vpop.permute.xlu1 %1486 }
 0x2f7   :  { %v1501_v28 = vsel %vm1153_vm3, %v2868_v16, %v1487_v43  ;;  %v1786_v16 = vld [vmem:[%s3019_s6] ss:$0 sm:$0xff] }
 0x2f8   :  { %v1479_v0 = vmax.f32 %v1474_v34, %v1463_v19 }
 0x2fc   :  { %v1437_v57 = vpop.f32.mrf.mxu1 }
 0x2fd   :  { %v1438_v4 = vadd.f32 %v2800_v33, %v1437_v57  ;;  %v1550_v33 = vld [vmem:[%s3020_s7 + $0x38] sm:$0xff] }
 0x2fe   :  { %1576 = vmatpush.msrb.mxu3 %v1550_v33 }
 0x2ff   :  { %v1464_v22 = vmax.f32 %v1438_v4, 0.0 }
 0x300   :  { %1577 = vmatpush.msrb.mxu3 %v1549_v7 }
 0x301   :  { %v1484_v48 = vmax.f32 %v1479_v0, %v1464_v22 }
 0x302   :  { %1578 = vmatpush.msrb.mxu3 %v1548_v49 }
 0x303   :  { %1498 = vrot.lane.b32.xlu1 %v1484_v48, %s1816_s21 }
 0x304   :  { %1579 = vmatpush.msrb.mxu3 %v1547_v55 }
 0x306   :  { %1580 = vmatpush.msrb.mxu3 %v1546_v23  ;;  %v1491_v10 = vpop.permute.xlu2 %1490 }
 0x307   :  { %v1502_v25 = vsel %vm1179_vm2, %v1501_v28, %v1491_v10 }
 0x308   :  { %1581 = vmatpush.msrb.mxu3 %v1545_v39 }
 0x30a   :  { %1582 = vmatpush.msrb.mxu3 %v1544_v47 }
 0x30c   :  { %1583 = vmatpush.msrb.mxu3 %v1543_v51 }
 0x346   :  { %v1495_v29 = vpop.permute.xlu0 %1494 }
 0x347   :  { %v1503_v9 = vsel %vm1205_vm5, %v1502_v25, %v1495_v29 }
 0x375   :  { %v1499_v13 = vpop.permute.xlu1 %1498 }
 0x376   :  { %v1504_v42 = vsel %vm1231_vm6, %v1503_v9, %v1499_v13 }
 0x377   :  { %1756 = vmatmul.msk.f32.vlgmr.msrb.gmra.mxu2 %vm1268_vm7, %v1504_v42 }
 0x3fa   :  { %v1539_v61 = vpop.f32.mrf.mxu2 }
 0x3fb   :  { %v1540_v45 = vadd.f32 %v1786_v16, %v1539_v61 }
 0x3fd   :  { %v1542_v26 = vmax.f32 %v1540_v45, 0.0 }
 0x3ff   :  { %1758 = vmatmul.msk.f32.vlgmr.msrb.gmra.mxu3 %vm1560_vm10, %v1542_v26 }
 0x482   :  { %v1585_v44 = vpop.f32.mrf.mxu3 }
 0x483   :  { %v1586_v63 = vadd.f32 %v1787_v36, %v1585_v44 }
 0x485   :  { %v1588_v8 = vmax.f32 %v1586_v63, 0.0 }
 0x487   :  { %1760 = vmatmul.msk.f32.vlgmr.msra.gmra.mxu2 %vm1205_vm5, %v1588_v8 }
 0x50a   :  { %v1621_v15 = vpop.f32.mrf.mxu2 }
 0x50b   :  { %v1622_v52 = vadd.f32 %v1788_v30, %v1621_v15 }
 0x50d   :  { %1624 = vst.msk [vmem:[#allocation2] sm:$0xff] %vm1179_vm2, %v1622_v52 }
 0x50e   :  { %1635 = dma.vmem_to_hbm [thread:$0]  %s1631_s23, 128, %s1633_s9, [#allocation3]  }
 0x50f   :  { %1814 = dma.done.wait [#allocation3], 128  }
 0x510   :  { %1815 = vsyncadd [#allocation3], 4294967168 }
 0x511   :  { %1640 = vsyncpa [#allocation3], 1 }

</bundles_post_ra>
